<compile_context>
chip_gen: v7x
topology: tpu7x:2x2x1
jax: 0.10.0
libtpu: 0.0.40
codegen_flags: <defaults>
</compile_context>

<pallas_src>
import functools

import jax
import jax.numpy as jnp
from jax.experimental import pallas as pl
from jax.experimental.pallas import tpu as pltpu


def _round_up(x, m):
    return ((x + m - 1) // m) * m


def sstcn_kernel(h_ref, wd_ref, bd_ref, w1_ref, b1_ref, w_out_ref, b_out_ref,
                 o_ref, *, num_layers, tile_t, halo, seq_len):
    h = h_ref[0, 0].astype(jnp.float32)        # (W, Fp) halo window, f32 residual
    W = h.shape[0]

    # Global time index of every window row.  Rows outside [0, seq_len) emulate
    # the per-layer zero padding of the dilated convs (only boundary tiles have
    # any invalid rows; interior tiles get an all-ones mask).
    g0 = pl.program_id(1) * tile_t - halo
    row = jax.lax.broadcasted_iota(jnp.int32, (W, 1), 0)
    g = row + g0
    vmask = jnp.logical_and(g >= 0, g < seq_len).astype(jnp.float32)   # (W, 1)

    for l in range(num_layers):                # static unroll; d is a Python int
        d = 2 ** l
        # Per-layer zero padding: conv inputs must read 0 outside the sequence.
        hm = h * vmask                                               # f32 (W, Fp)
        # Dilated conv, kernel size 3, padding=dilation=d:
        #   z[t] = W0 @ h[t-d] + W1 @ h[t] + W2 @ h[t+d]
        # Rolls go to the XLU; wrap-around garbage only contaminates the outer
        # (2^L - 1) <= halo rows, which are never emitted.
        h_prev = pltpu.roll(hm, shift=d, axis=0).astype(jnp.bfloat16)
        h_next = pltpu.roll(hm, shift=W - d, axis=0).astype(jnp.bfloat16)
        # Fused 3-tap matmul: (W, 3Fp) @ (3Fp, Fp); concat built directly in
        # bf16 (no f32 temporary), f32 MXU accumulation.
        h_cat = jnp.concatenate([h_prev, hm.astype(jnp.bfloat16), h_next], axis=-1)
        z = jnp.dot(h_cat, wd_ref[l], preferred_element_type=jnp.float32) + bd_ref[l]
        z = jnp.maximum(z, 0.0)                                      # ReLU (f32)
        z = jnp.dot(z.astype(jnp.bfloat16), w1_ref[l],
                    preferred_element_type=jnp.float32) + b1_ref[l]
        # TODO(synk): nn.Dropout() treated as identity (inference mode), no RNG drop.
        h = h + z                                                    # residual (f32)

    # Final 1x1 conv only on the interior rows (halo rows are discarded).
    h_int = h[halo:halo + tile_t].astype(jnp.bfloat16)
    o_ref[0, 0] = jnp.dot(h_int, w_out_ref[...],
                          preferred_element_type=jnp.float32) + b_out_ref[...]


def ss_tcn_forward(x_nct, mask_nct, params, num_layers, tile_t=None):
    """x_nct: (N, dim, T); mask_nct: (N, num_classes, T). Returns (N, num_classes, T)."""
    N, D, T = x_nct.shape
    F = params["w_in"].shape[1]
    K = params["w_out"].shape[1]
    L = num_layers

    Fp = _round_up(F, 128)                     # lane-dense feature width
    Kp = _round_up(K, 128)                     # lane-dense output width
    halo = _round_up(2 ** L - 1, 8)            # receptive-field halo, sublane aligned

    if tile_t is None:
        tile_t = min(2048, _round_up(T, 8))    # ~2K keeps per-step VMEM small on v7x
    tile_t = max(8, _round_up(tile_t, 8))
    T_pad = _round_up(T, tile_t)
    nt = T_pad // tile_t
    W = tile_t + 2 * halo                      # per-tile window length

    # --- Input 1x1 conv hoisted out of the kernel (bf16 MXU einsum).  Padding
    # goes on the (dim, F) weight, never on the (N, T, F) activation.
    w_in = jnp.pad(params["w_in"], ((0, 0), (0, Fp - F))).astype(jnp.bfloat16)
    b_in = jnp.pad(params["b_in"][0], ((0, Fp - F),)).astype(jnp.float32)
    x = jnp.transpose(x_nct, (0, 2, 1)).astype(jnp.bfloat16)          # (N, T, D)
    h0 = jnp.einsum("ntd,df->ntf", x, w_in,
                    preferred_element_type=jnp.float32) + b_in
    h0 = h0.astype(jnp.bfloat16)                                      # (N, T, Fp) bf16

    # --- Overlapping halo windows, built once in HBM (values outside the real
    # sequence are don't-care: the kernel masks them per layer).
    # TODO(synk): for very long T replace this gather with element-indexed
    # BlockSpecs or a manual-DMA halo load to avoid the (W/tile_t)x HBM copy.
    h0p = jnp.pad(h0, ((0, 0), (halo, halo + (T_pad - T)), (0, 0)))
    h0w = jnp.stack([h0p[:, t * tile_t: t * tile_t + W, :] for t in range(nt)],
                    axis=1)                                           # (N, nt, W, Fp)

    # --- Weights: pad to lane-dense widths, fuse the 3 dilated taps into one
    # (3Fp, Fp) contraction per layer, pre-cast matmul weights to bf16.
    # TODO(synk): on v5e (MXU-bound) pack the taps at un-padded width F to avoid
    # contracting over the Fp-F zero lanes per tap.
    wd = jnp.pad(params["wd"], ((0, 0), (0, 0), (0, Fp - F), (0, Fp - F)))
    wd = wd.reshape(L, 3 * Fp, Fp).astype(jnp.bfloat16)               # (L, 3Fp, Fp)
    bd = jnp.pad(params["bd"], ((0, 0), (0, 0), (0, Fp - F))).astype(jnp.float32)
    w1 = jnp.pad(params["w1"], ((0, 0), (0, Fp - F), (0, Fp - F))).astype(jnp.bfloat16)
    b1 = jnp.pad(params["b1"], ((0, 0), (0, 0), (0, Fp - F))).astype(jnp.float32)
    w_out = jnp.pad(params["w_out"], ((0, Fp - F), (0, Kp - K))).astype(jnp.bfloat16)
    b_out = jnp.pad(params["b_out"], ((0, 0), (0, Kp - K))).astype(jnp.float32)

    def const_spec(shape):
        nd = len(shape)
        # Constant-index weight blocks: fetched once and single-buffered
        # (double-buffering them only doubles their VMEM footprint).
        return pl.BlockSpec(shape, lambda n, t, _nd=nd: (0,) * _nd,
                            pipeline_mode=pl.Buffered(1))

    kernel = functools.partial(sstcn_kernel, num_layers=L, tile_t=tile_t,
                               halo=halo, seq_len=T)
    out = pl.pallas_call(
        kernel,
        out_shape=jax.ShapeDtypeStruct((N, nt, tile_t, Kp), jnp.float32),
        grid=(N, nt),
        in_specs=[
            pl.BlockSpec((1, 1, W, Fp), lambda n, t: (n, t, 0, 0)),   # halo window
            const_spec(wd.shape),
            const_spec(bd.shape),
            const_spec(w1.shape),
            const_spec(b1.shape),
            const_spec(w_out.shape),
            const_spec(b_out.shape),
        ],
        out_specs=pl.BlockSpec((1, 1, tile_t, Kp), lambda n, t: (n, t, 0, 0)),
        compiler_params=pltpu.CompilerParams(
            dimension_semantics=("parallel", "parallel"),
            vmem_limit_bytes=48 * 1024 * 1024),
    )(h0w, wd, bd, w1, b1, w_out, b_out)

    out = out.reshape(N, T_pad, Kp)[:, :T, :K]              # drop tail / lane pad
    out = jnp.transpose(out, (0, 2, 1)) * mask_nct[:, 0:1, :]   # mask as in SS_TCN
    return out                                               # (N, K, T)


def ss_tcn_reference(x_nct, mask_nct, params, num_layers):
    """Pure-JAX reference with the SAME bf16 cast points as the kernel."""
    x = jnp.transpose(x_nct, (0, 2, 1)).astype(jnp.bfloat16)
    h = jnp.einsum("ntd,df->ntf", x, params["w_in"].astype(jnp.bfloat16),
                   preferred_element_type=jnp.float32) + params["b_in"][0]
    h = h.astype(jnp.bfloat16).astype(jnp.float32)           # mirrors bf16 h0 pass
    T = h.shape[1]
    wd = params["wd"].astype(jnp.bfloat16)
    w1 = params["w1"].astype(jnp.bfloat16)
    for l in range(num_layers):
        d = 2 ** l
        hb = h.astype(jnp.bfloat16)
        hp = jnp.pad(hb, ((0, 0), (d, 0), (0, 0)))[:, :T]
        hn = jnp.pad(hb, ((0, 0), (0, d), (0, 0)))[:, d:]
        z = (jnp.einsum("ntf,fg->ntg", hp, wd[l, 0], preferred_element_type=jnp.float32)
             + jnp.einsum("ntf,fg->ntg", hb, wd[l, 1], preferred_element_type=jnp.float32)
             + jnp.einsum("ntf,fg->ntg", hn, wd[l, 2], preferred_element_type=jnp.float32)
             + params["bd"][l, 0])
        z = jax.nn.relu(z)
        z = jnp.einsum("ntf,fg->ntg", z.astype(jnp.bfloat16), w1[l],
                       preferred_element_type=jnp.float32) + params["b1"][l, 0]
        h = h + z
    out = jnp.einsum("ntf,fk->ntk", h.astype(jnp.bfloat16),
                     params["w_out"].astype(jnp.bfloat16),
                     preferred_element_type=jnp.float32) + params["b_out"][0]
    out = out * jnp.transpose(mask_nct[:, 0:1, :], (0, 2, 1))
    return jnp.transpose(out, (0, 2, 1))


def init_params(key, num_layers, num_f_maps, dim, num_classes):
    ks = jax.random.split(key, 8)
    s = 0.1
    return {
        # conv_1x1: Conv1d(dim, F, 1)  -> stored as (dim, F) for x @ W
        "w_in": s * jax.random.normal(ks[0], (dim, num_f_maps), jnp.float32),
        "b_in": s * jax.random.normal(ks[1], (1, num_f_maps), jnp.float32),
        # per-layer dilated conv: Conv1d(F, F, 3) -> (L, 3 taps, F_in, F_out)
        "wd": s * jax.random.normal(ks[2], (num_layers, 3, num_f_maps, num_f_maps), jnp.float32),
        "bd": s * jax.random.normal(ks[3], (num_layers, 1, num_f_maps), jnp.float32),
        # per-layer conv_1x1: Conv1d(F, F, 1)
        "w1": s * jax.random.normal(ks[4], (num_layers, num_f_maps, num_f_maps), jnp.float32),
        "b1": s * jax.random.normal(ks[5], (num_layers, 1, num_f_maps), jnp.float32),
        # conv_out: Conv1d(F, num_classes, 1)
        "w_out": s * jax.random.normal(ks[6], (num_f_maps, num_classes), jnp.float32),
        "b_out": s * jax.random.normal(ks[7], (1, num_classes), jnp.float32),
    }


if __name__ == "__main__":
    N, dim, T = 2, 4, 16
    num_layers, num_f_maps, num_classes = 3, 32, 8

    key = jax.random.PRNGKey(0)
    k_x, k_p = jax.random.split(key)
    x = jax.random.normal(k_x, (N, dim, T), jnp.float32)             # PyTorch NCT
    # binary mask (N, num_classes, T): second sequence padded after t=10
    lengths = jnp.array([T, 10])
    m_row = (jnp.arange(T)[None, :] < lengths[:, None]).astype(jnp.float32)  # (N, T)
    mask = jnp.broadcast_to(m_row[:, None, :], (N, num_classes, T))

    params = init_params(k_p, num_layers, num_f_maps, dim, num_classes)

    # tile_t=8 -> grid (2 batches x 2 time tiles) with an 8-row halo: exercises
    # the haloed T-tiling path, not just the single-block case.
    out = ss_tcn_forward(x, mask, params, num_layers, tile_t=8)
    out = jax.block_until_ready(out)

    ref = ss_tcn_reference(x, mask, params, num_layers)
    assert out.shape == (N, num_classes, T)
    assert jnp.allclose(out, ref, atol=1e-2, rtol=1e-2), "mismatch vs JAX reference"
    print("KERNEL_OK")
</pallas_src>

<mosaic_0001>
module attributes {stable_mosaic.version = 11 : i64} {
  func.func @sstcn_kernel(%arg0: i32, %arg1: i32, %arg2: memref<1x1x24x128xbf16, #tpu.memory_space<vmem>>, %arg3: memref<3x384x128xbf16, #tpu.memory_space<vmem>>, %arg4: memref<3x1x128xf32, #tpu.memory_space<vmem>>, %arg5: memref<3x128x128xbf16, #tpu.memory_space<vmem>>, %arg6: memref<3x1x128xf32, #tpu.memory_space<vmem>>, %arg7: memref<128x128xbf16, #tpu.memory_space<vmem>>, %arg8: memref<1x128xf32, #tpu.memory_space<vmem>>, %arg9: memref<1x1x8x128xf32, #tpu.memory_space<vmem>>) attributes {dimension_semantics = [#tpu.dimension_semantics<parallel>, #tpu.dimension_semantics<parallel>], iteration_bounds = array<i64: 2, 2>, scalar_prefetch = 0 : i64, scratch_operands = 0 : i64, tpu.core_type = #tpu.core_type<tc>, window_params = [{transform_indices = @transform_0, window_bounds = array<i64: 1, 1, 24, 128>}, {pipeline_mode = #tpu.pipeline_mode<synchronous>, transform_indices = @transform_1, window_bounds = array<i64: 3, 384, 128>}, {pipeline_mode = #tpu.pipeline_mode<synchronous>, transform_indices = @transform_2, window_bounds = array<i64: 3, 1, 128>}, {pipeline_mode = #tpu.pipeline_mode<synchronous>, transform_indices = @transform_3, window_bounds = array<i64: 3, 128, 128>}, {pipeline_mode = #tpu.pipeline_mode<synchronous>, transform_indices = @transform_4, window_bounds = array<i64: 3, 1, 128>}, {pipeline_mode = #tpu.pipeline_mode<synchronous>, transform_indices = @transform_5, window_bounds = array<i64: 128, 128>}, {pipeline_mode = #tpu.pipeline_mode<synchronous>, transform_indices = @transform_6, window_bounds = array<i64: 1, 128>}, {transform_indices = @transform_7, window_bounds = array<i64: 1, 1, 8, 128>}]} {
    %c0 = arith.constant 0 : index
    %c0_0 = arith.constant 0 : index
    %c0_1 = arith.constant 0 : index
    %c0_2 = arith.constant 0 : index
    %0 = vector.load %arg2[%c0, %c0_0, %c0_1, %c0_2] : memref<1x1x24x128xbf16, #tpu.memory_space<vmem>>, vector<1x1x24x128xbf16>
    %1 = vector.shape_cast %0 : vector<1x1x24x128xbf16> to vector<24x128xbf16>
    %2 = arith.extf %1 : vector<24x128xbf16> to vector<24x128xf32>
    %c8_i32 = arith.constant 8 : i32
    %3 = arith.muli %arg1, %c8_i32 : i32
    %c8_i32_3 = arith.constant 8 : i32
    %4 = arith.subi %3, %c8_i32_3 : i32
    %5 = tpu.iota {dimensions = array<i32: 0>} : vector<24x1xi32>
    %6 = vector.broadcast %4 : i32 to vector<24x1xi32>
    %7 = arith.addi %5, %6 : vector<24x1xi32>
    %c0_i32 = arith.constant 0 : i32
    %8 = vector.broadcast %c0_i32 : i32 to vector<24x1xi32>
    %9 = arith.cmpi sge, %7, %8 : vector<24x1xi32>
    %c16_i32 = arith.constant 16 : i32
    %10 = vector.broadcast %c16_i32 : i32 to vector<24x1xi32>
    %11 = arith.cmpi slt, %7, %10 : vector<24x1xi32>
    %12 = arith.andi %9, %11 : vector<24x1xi1>
    %13 = arith.extui %12 : vector<24x1xi1> to vector<24x1xi32>
    %14 = arith.sitofp %13 : vector<24x1xi32> to vector<24x1xf32>
    %15 = vector.broadcast %14 : vector<24x1xf32> to vector<24x128xf32>
    %16 = arith.mulf %2, %15 : vector<24x128xf32>
    %c1_i32 = arith.constant 1 : i32
    %17 = tpu.dynamic_rotate %16 by %c1_i32 dim 0 : vector<24x128xf32>, i32 -> vector<24x128xf32>
    %18 = arith.truncf %17 : vector<24x128xf32> to vector<24x128xbf16>
    %c23_i32 = arith.constant 23 : i32
    %19 = tpu.dynamic_rotate %16 by %c23_i32 dim 0 : vector<24x128xf32>, i32 -> vector<24x128xf32>
    %20 = arith.truncf %19 : vector<24x128xf32> to vector<24x128xbf16>
    %21 = arith.truncf %16 : vector<24x128xf32> to vector<24x128xbf16>
    %22 = tpu.concatenate %18, %21, %20 in 1 : vector<24x128xbf16>, vector<24x128xbf16>, vector<24x128xbf16> -> vector<24x384xbf16>
    %c0_4 = arith.constant 0 : index
    %c0_5 = arith.constant 0 : index
    %c0_6 = arith.constant 0 : index
    %23 = vector.load %arg3[%c0_4, %c0_5, %c0_6] : memref<3x384x128xbf16, #tpu.memory_space<vmem>>, vector<1x384x128xbf16>
    %24 = vector.shape_cast %23 : vector<1x384x128xbf16> to vector<384x128xbf16>
    %cst = arith.constant dense<0.000000e+00> : vector<24x128xf32>
    %25 = tpu.matmul %22, %24, %cst {dimension_numbers = #tpu.dot_dimension_numbers<[1], [0], [0], [1], [0, 0, 1, 1], [], []>} : vector<24x384xbf16>, vector<384x128xbf16>, vector<24x128xf32> -> vector<24x128xf32>
    %c0_7 = arith.constant 0 : index
    %c0_8 = arith.constant 0 : index
    %c0_9 = arith.constant 0 : index
    %26 = vector.load %arg4[%c0_7, %c0_8, %c0_9] : memref<3x1x128xf32, #tpu.memory_space<vmem>>, vector<1x1x128xf32>
    %27 = vector.shape_cast %26 : vector<1x1x128xf32> to vector<1x128xf32>
    %28 = vector.broadcast %27 : vector<1x128xf32> to vector<24x128xf32>
    %29 = arith.addf %25, %28 : vector<24x128xf32>
    %cst_10 = arith.constant 0.000000e+00 : f32
    %30 = vector.broadcast %cst_10 : f32 to vector<24x128xf32>
    %31 = arith.maximumf %29, %30 : vector<24x128xf32>
    %32 = arith.truncf %31 : vector<24x128xf32> to vector<24x128xbf16>
    %c0_11 = arith.constant 0 : index
    %c0_12 = arith.constant 0 : index
    %c0_13 = arith.constant 0 : index
    %33 = vector.load %arg5[%c0_11, %c0_12, %c0_13] : memref<3x128x128xbf16, #tpu.memory_space<vmem>>, vector<1x128x128xbf16>
    %34 = vector.shape_cast %33 : vector<1x128x128xbf16> to vector<128x128xbf16>
    %cst_14 = arith.constant dense<0.000000e+00> : vector<24x128xf32>
    %35 = tpu.matmul %32, %34, %cst_14 {dimension_numbers = #tpu.dot_dimension_numbers<[1], [0], [0], [1], [0, 0, 1, 1], [], []>} : vector<24x128xbf16>, vector<128x128xbf16>, vector<24x128xf32> -> vector<24x128xf32>
    %c0_15 = arith.constant 0 : index
    %c0_16 = arith.constant 0 : index
    %c0_17 = arith.constant 0 : index
    %36 = vector.load %arg6[%c0_15, %c0_16, %c0_17] : memref<3x1x128xf32, #tpu.memory_space<vmem>>, vector<1x1x128xf32>
    %37 = vector.shape_cast %36 : vector<1x1x128xf32> to vector<1x128xf32>
    %38 = vector.broadcast %37 : vector<1x128xf32> to vector<24x128xf32>
    %39 = arith.addf %35, %38 : vector<24x128xf32>
    %40 = arith.addf %2, %39 : vector<24x128xf32>
    %41 = vector.broadcast %14 : vector<24x1xf32> to vector<24x128xf32>
    %42 = arith.mulf %40, %41 : vector<24x128xf32>
    %c2_i32 = arith.constant 2 : i32
    %43 = tpu.dynamic_rotate %42 by %c2_i32 dim 0 : vector<24x128xf32>, i32 -> vector<24x128xf32>
    %44 = arith.truncf %43 : vector<24x128xf32> to vector<24x128xbf16>
    %c22_i32 = arith.constant 22 : i32
    %45 = tpu.dynamic_rotate %42 by %c22_i32 dim 0 : vector<24x128xf32>, i32 -> vector<24x128xf32>
    %46 = arith.truncf %45 : vector<24x128xf32> to vector<24x128xbf16>
    %47 = arith.truncf %42 : vector<24x128xf32> to vector<24x128xbf16>
    %48 = tpu.concatenate %44, %47, %46 in 1 : vector<24x128xbf16>, vector<24x128xbf16>, vector<24x128xbf16> -> vector<24x384xbf16>
    %c1 = arith.constant 1 : index
    %c0_18 = arith.constant 0 : index
    %c0_19 = arith.constant 0 : index
    %49 = vector.load %arg3[%c1, %c0_18, %c0_19] : memref<3x384x128xbf16, #tpu.memory_space<vmem>>, vector<1x384x128xbf16>
    %50 = vector.shape_cast %49 : vector<1x384x128xbf16> to vector<384x128xbf16>
    %cst_20 = arith.constant dense<0.000000e+00> : vector<24x128xf32>
    %51 = tpu.matmul %48, %50, %cst_20 {dimension_numbers = #tpu.dot_dimension_numbers<[1], [0], [0], [1], [0, 0, 1, 1], [], []>} : vector<24x384xbf16>, vector<384x128xbf16>, vector<24x128xf32> -> vector<24x128xf32>
    %c1_21 = arith.constant 1 : index
    %c0_22 = arith.constant 0 : index
    %c0_23 = arith.constant 0 : index
    %52 = vector.load %arg4[%c1_21, %c0_22, %c0_23] : memref<3x1x128xf32, #tpu.memory_space<vmem>>, vector<1x1x128xf32>
    %53 = vector.shape_cast %52 : vector<1x1x128xf32> to vector<1x128xf32>
    %54 = vector.broadcast %53 : vector<1x128xf32> to vector<24x128xf32>
    %55 = arith.addf %51, %54 : vector<24x128xf32>
    %cst_24 = arith.constant 0.000000e+00 : f32
    %56 = vector.broadcast %cst_24 : f32 to vector<24x128xf32>
    %57 = arith.maximumf %55, %56 : vector<24x128xf32>
    %58 = arith.truncf %57 : vector<24x128xf32> to vector<24x128xbf16>
    %c1_25 = arith.constant 1 : index
    %c0_26 = arith.constant 0 : index
    %c0_27 = arith.constant 0 : index
    %59 = vector.load %arg5[%c1_25, %c0_26, %c0_27] : memref<3x128x128xbf16, #tpu.memory_space<vmem>>, vector<1x128x128xbf16>
    %60 = vector.shape_cast %59 : vector<1x128x128xbf16> to vector<128x128xbf16>
    %cst_28 = arith.constant dense<0.000000e+00> : vector<24x128xf32>
    %61 = tpu.matmul %58, %60, %cst_28 {dimension_numbers = #tpu.dot_dimension_numbers<[1], [0], [0], [1], [0, 0, 1, 1], [], []>} : vector<24x128xbf16>, vector<128x128xbf16>, vector<24x128xf32> -> vector<24x128xf32>
    %c1_29 = arith.constant 1 : index
    %c0_30 = arith.constant 0 : index
    %c0_31 = arith.constant 0 : index
    %62 = vector.load %arg6[%c1_29, %c0_30, %c0_31] : memref<3x1x128xf32, #tpu.memory_space<vmem>>, vector<1x1x128xf32>
    %63 = vector.shape_cast %62 : vector<1x1x128xf32> to vector<1x128xf32>
    %64 = vector.broadcast %63 : vector<1x128xf32> to vector<24x128xf32>
    %65 = arith.addf %61, %64 : vector<24x128xf32>
    %66 = arith.addf %40, %65 : vector<24x128xf32>
    %67 = vector.broadcast %14 : vector<24x1xf32> to vector<24x128xf32>
    %68 = arith.mulf %66, %67 : vector<24x128xf32>
    %c4_i32 = arith.constant 4 : i32
    %69 = tpu.dynamic_rotate %68 by %c4_i32 dim 0 : vector<24x128xf32>, i32 -> vector<24x128xf32>
    %70 = arith.truncf %69 : vector<24x128xf32> to vector<24x128xbf16>
    %c20_i32 = arith.constant 20 : i32
    %71 = tpu.dynamic_rotate %68 by %c20_i32 dim 0 : vector<24x128xf32>, i32 -> vector<24x128xf32>
    %72 = arith.truncf %71 : vector<24x128xf32> to vector<24x128xbf16>
    %73 = arith.truncf %68 : vector<24x128xf32> to vector<24x128xbf16>
    %74 = tpu.concatenate %70, %73, %72 in 1 : vector<24x128xbf16>, vector<24x128xbf16>, vector<24x128xbf16> -> vector<24x384xbf16>
    %c2 = arith.constant 2 : index
    %c0_32 = arith.constant 0 : index
    %c0_33 = arith.constant 0 : index
    %75 = vector.load %arg3[%c2, %c0_32, %c0_33] : memref<3x384x128xbf16, #tpu.memory_space<vmem>>, vector<1x384x128xbf16>
    %76 = vector.shape_cast %75 : vector<1x384x128xbf16> to vector<384x128xbf16>
    %cst_34 = arith.constant dense<0.000000e+00> : vector<24x128xf32>
    %77 = tpu.matmul %74, %76, %cst_34 {dimension_numbers = #tpu.dot_dimension_numbers<[1], [0], [0], [1], [0, 0, 1, 1], [], []>} : vector<24x384xbf16>, vector<384x128xbf16>, vector<24x128xf32> -> vector<24x128xf32>
    %c2_35 = arith.constant 2 : index
    %c0_36 = arith.constant 0 : index
    %c0_37 = arith.constant 0 : index
    %78 = vector.load %arg4[%c2_35, %c0_36, %c0_37] : memref<3x1x128xf32, #tpu.memory_space<vmem>>, vector<1x1x128xf32>
    %79 = vector.shape_cast %78 : vector<1x1x128xf32> to vector<1x128xf32>
    %80 = vector.broadcast %79 : vector<1x128xf32> to vector<24x128xf32>
    %81 = arith.addf %77, %80 : vector<24x128xf32>
    %cst_38 = arith.constant 0.000000e+00 : f32
    %82 = vector.broadcast %cst_38 : f32 to vector<24x128xf32>
    %83 = arith.maximumf %81, %82 : vector<24x128xf32>
    %84 = arith.truncf %83 : vector<24x128xf32> to vector<24x128xbf16>
    %c2_39 = arith.constant 2 : index
    %c0_40 = arith.constant 0 : index
    %c0_41 = arith.constant 0 : index
    %85 = vector.load %arg5[%c2_39, %c0_40, %c0_41] : memref<3x128x128xbf16, #tpu.memory_space<vmem>>, vector<1x128x128xbf16>
    %86 = vector.shape_cast %85 : vector<1x128x128xbf16> to vector<128x128xbf16>
    %cst_42 = arith.constant dense<0.000000e+00> : vector<24x128xf32>
    %87 = tpu.matmul %84, %86, %cst_42 {dimension_numbers = #tpu.dot_dimension_numbers<[1], [0], [0], [1], [0, 0, 1, 1], [], []>} : vector<24x128xbf16>, vector<128x128xbf16>, vector<24x128xf32> -> vector<24x128xf32>
    %c2_43 = arith.constant 2 : index
    %c0_44 = arith.constant 0 : index
    %c0_45 = arith.constant 0 : index
    %88 = vector.load %arg6[%c2_43, %c0_44, %c0_45] : memref<3x1x128xf32, #tpu.memory_space<vmem>>, vector<1x1x128xf32>
    %89 = vector.shape_cast %88 : vector<1x1x128xf32> to vector<1x128xf32>
    %90 = vector.broadcast %89 : vector<1x128xf32> to vector<24x128xf32>
    %91 = arith.addf %87, %90 : vector<24x128xf32>
    %92 = arith.addf %66, %91 : vector<24x128xf32>
    %93 = vector.extract_strided_slice %92 {offsets = [8, 0], sizes = [8, 128], strides = [1, 1]} : vector<24x128xf32> to vector<8x128xf32>
    %94 = arith.truncf %93 : vector<8x128xf32> to vector<8x128xbf16>
    %c0_46 = arith.constant 0 : index
    %c0_47 = arith.constant 0 : index
    %95 = vector.load %arg7[%c0_46, %c0_47] : memref<128x128xbf16, #tpu.memory_space<vmem>>, vector<128x128xbf16>
    %cst_48 = arith.constant dense<0.000000e+00> : vector<8x128xf32>
    %96 = tpu.matmul %94, %95, %cst_48 {dimension_numbers = #tpu.dot_dimension_numbers<[1], [0], [0], [1], [0, 0, 1, 1], [], []>} : vector<8x128xbf16>, vector<128x128xbf16>, vector<8x128xf32> -> vector<8x128xf32>
    %c0_49 = arith.constant 0 : index
    %c0_50 = arith.constant 0 : index
    %97 = vector.load %arg8[%c0_49, %c0_50] : memref<1x128xf32, #tpu.memory_space<vmem>>, vector<1x128xf32>
    %98 = vector.broadcast %97 : vector<1x128xf32> to vector<8x128xf32>
    %99 = arith.addf %96, %98 : vector<8x128xf32>
    %c0_51 = arith.constant 0 : index
    %c0_52 = arith.constant 0 : index
    %c0_53 = arith.constant 0 : index
    %c0_54 = arith.constant 0 : index
    %100 = vector.load %arg9[%c0_51, %c0_52, %c0_53, %c0_54] : memref<1x1x8x128xf32, #tpu.memory_space<vmem>>, vector<1x1x8x128xf32>
    %101 = vector.shape_cast %100 : vector<1x1x8x128xf32> to vector<8x128xf32>
    %102 = vector.shape_cast %99 : vector<8x128xf32> to vector<1x1x8x128xf32>
    tpu.vector_store %arg9[%c0_51, %c0_52, %c0_53, %c0_54], %102 {strides = array<i32>} : memref<1x1x8x128xf32, #tpu.memory_space<vmem>>, vector<1x1x8x128xf32>,
    return
  }
  func.func @transform_0(%arg0: i32, %arg1: i32) -> (i32, i32, i32, i32) {
    %c0_i32 = arith.constant 0 : i32
    %c0_i32_0 = arith.constant 0 : i32
    %c0_i32_1 = arith.constant 0 : i32
    return %arg0, %arg1, %c0_i32, %c0_i32_0 : i32, i32, i32, i32
  }
  func.func @transform_1(%arg0: i32, %arg1: i32) -> (i32, i32, i32) {
    %c0_i32 = arith.constant 0 : i32
    %c0_i32_0 = arith.constant 0 : i32
    %c0_i32_1 = arith.constant 0 : i32
    %c0_i32_2 = arith.constant 0 : i32
    return %c0_i32, %c0_i32_0, %c0_i32_1 : i32, i32, i32
  }
  func.func @transform_2(%arg0: i32, %arg1: i32) -> (i32, i32, i32) {
    %c0_i32 = arith.constant 0 : i32
    %c0_i32_0 = arith.constant 0 : i32
    %c0_i32_1 = arith.constant 0 : i32
    %c0_i32_2 = arith.constant 0 : i32
    return %c0_i32, %c0_i32_0, %c0_i32_1 : i32, i32, i32
  }
  func.func @transform_3(%arg0: i32, %arg1: i32) -> (i32, i32, i32) {
    %c0_i32 = arith.constant 0 : i32
    %c0_i32_0 = arith.constant 0 : i32
    %c0_i32_1 = arith.constant 0 : i32
    %c0_i32_2 = arith.constant 0 : i32
    return %c0_i32, %c0_i32_0, %c0_i32_1 : i32, i32, i32
  }
  func.func @transform_4(%arg0: i32, %arg1: i32) -> (i32, i32, i32) {
    %c0_i32 = arith.constant 0 : i32
    %c0_i32_0 = arith.constant 0 : i32
    %c0_i32_1 = arith.constant 0 : i32
    %c0_i32_2 = arith.constant 0 : i32
    return %c0_i32, %c0_i32_0, %c0_i32_1 : i32, i32, i32
  }
  func.func @transform_5(%arg0: i32, %arg1: i32) -> (i32, i32) {
    %c0_i32 = arith.constant 0 : i32
    %c0_i32_0 = arith.constant 0 : i32
    %c0_i32_1 = arith.constant 0 : i32
    return %c0_i32, %c0_i32_0 : i32, i32
  }
  func.func @transform_6(%arg0: i32, %arg1: i32) -> (i32, i32) {
    %c0_i32 = arith.constant 0 : i32
    %c0_i32_0 = arith.constant 0 : i32
    %c0_i32_1 = arith.constant 0 : i32
    return %c0_i32, %c0_i32_0 : i32, i32
  }
  func.func @transform_7(%arg0: i32, %arg1: i32) -> (i32, i32, i32, i32) {
    %c0_i32 = arith.constant 0 : i32
    %c0_i32_0 = arith.constant 0 : i32
    %c0_i32_1 = arith.constant 0 : i32
    return %arg0, %arg1, %c0_i32, %c0_i32_0 : i32, i32, i32, i32
  }
}

</mosaic_0001>

<bundles_post_ra>
// kernel: tpu_custom_call.1
= control target key start
LH: loop header
LB: loop body
LE: loop exit
PB: predicated region body
PF: predicated region fallthrough
CT: control target
= control target key end

     0   :  { %s3325_s0 = inlined_call_operand.hbm [shape: bf16[2,2,24,128], index: 0, kind: input, shape index: {}]   ;;  %s3326_s1 = inlined_call_operand.hbm [shape: bf16[3,384,128], index: 1, kind: input, shape index: {}]   ;;  %s3327_s2 = inlined_call_operand.vmem [shape: f32[3,1,128], index: 2, kind: input, shape index: {}]   ;;  %s3328_s3 = inlined_call_operand.hbm [shape: bf16[3,128,128], index: 3, kind: input, shape index: {}]   ;;  %s3329_s4 = inlined_call_operand.vmem [shape: f32[3,1,128], index: 4, kind: input, shape index: {}]   ;;  %s3330_s5 = inlined_call_operand.hbm [shape: bf16[128,128], index: 5, kind: input, shape index: {}]   ;;  %s3331_s6 = inlined_call_operand.vmem [shape: f32[1,128], index: 6, kind: input, shape index: {}]   ;;  %s3332_s7 = inlined_call_operand.hbm [shape: f32[2,2,8,128], index: 7, kind: output, shape index: {}]  }
   0x1   :  { %3343 = sst [smem:[#allocation18_spill]] %s3326_s1 }
   0x2   :  { %3344 = sst [smem:[#allocation19_spill]] %s3328_s3 }
   0x3   :  { %3345 = sst [smem:[#allocation20_spill]] %s3329_s4 }
   0x4   :  { %3346 = sst [smem:[#allocation21_spill]] %s3331_s6 }
   0x5   :  { %3347 = sst [smem:[#allocation22_spill]] %s3332_s7 }
   0x6   :  { %12 = vsyncpa [#allocation3], 0 }
   0x7   :  { %14 = vsyncpa [#allocation3 + $0x1], 0 }
   0x8   :  { %15 = vsyncpa [#allocation6], 0 }
   0x9   :  { %16 = vsyncpa [#allocation9], 0 }
   0xa   :  { %17 = vsyncpa [#allocation4], 0 }
   0xb   :  { %19 = vsyncpa [#allocation4 + $0x1], 0  ;;  %s2894_s24 = smov 0   ;;  %s2896_s25 = smov 0  }
   0xc   :  { %s2898_s26 = smov 0   ;;  %s2900_s27 = smov 0  }
   0xd   :  { %s2902_s28 = smov 0   ;;  %s2904_s29 = smov 0  }
   0xe   :  { %s2906_s30 = smov 0   ;;  %s2908_s8 = smov 0  }
   0xf LB: > { %3348 = sst [smem:[#allocation15_spill]] %s2815_s24  ;;  %s1967_s9 = sadd.s32 4294967295, %s2843_s8   ;;  %s2843_s8 = sphi %s2908_s8, %s25_s8   ;;  %s2839_s30 = sphi %s2906_s30, %s3382_s30   ;;  %s2835_s29 = sphi %s2904_s29, %s3381_s29   ;;  %s2831_s28 = sphi %s2902_s28, %s3380_s28   ;;  %s2827_s27 = sphi %s2900_s27, %s3379_s27   ;;  %s2823_s26 = sphi %s2898_s26, %s3378_s26   ;;  %s2819_s25 = sphi %s2896_s25, %s3377_s25   ;;  %s2815_s24 = sphi %s2894_s24, %s3376_s24  }
  0x10   : > { %3349 = sst [smem:[#allocation16_spill]] %s2831_s28  ;;  %s1968_s10 = sadd.s32 4294967294, %s2843_s8  }
  0x11   : > { %p59_p0 = scmp.ne.s32.totalorder %s2819_s25, %s2815_s24  ;;  %p2938_p1 = scmp.eq.s32.totalorder %s1967_s9, 0 }
  0x12   : > { %p2942_p2 = scmp.eq.s32.totalorder %s1967_s9, 3  ;;  %p217_p3 = scmp.eq.s32.totalorder %s1968_s10, 3 }
  0x13   : > { %s3350_s11 = scalar_select %p2938_p1, 1, 0 }
  0x14   : > { %s3351_s12 = scalar_select %p2942_p2, 1, 0 }
  0x15   : > { %p2948_p4 = por %p2938_p1, %p59_p0  ;;  %p1969_p5 = scmp.ge.s32.totalorder %s2843_s8, 1 }
  0x16   : > { %p2953_p6 = por %p217_p3, %p59_p0  ;;  %p224_p7 = scmp.lt.s32.totalorder %s2843_s8, 5 }
  0x17   : > { %s3352_s13 = scalar_select %p2948_p4, 1, 0 }
  0x18   : > { %s3353_s14 = scalar_select %p2953_p6, 1, 0 }
  0x19   : > { %p2958_p8 = pnand %p1969_p5, %p224_p7  ;;  %s2845_s16 = smov [#allocation5]  }
  0x1a   : > { %3354 = sst [smem:[#allocation17_spill]] %s3353_s14  ;;  %s236_s17 = sshll.u32 %s2845_s16, 4  ;;  %s2962_s17 = int_to_ptr.vmem [resolvable:$true] %s236_s17 }
  0x1b   : > { %s3355_s15 = scalar_select %p2958_p8, 1, 0 }
  0x1c   : > { %p2422_p9 = pneg %p2958_p8  ;;  %s2846_s19 = smov [#allocation7]  }
  0x1d   : > { %s252_s20 = sshll.u32 %s2846_s19, 4  ;;  %s2847_s21 = smov [#allocation8]   ;;  %s2972_s20 = int_to_ptr.vmem [resolvable:$true] %s252_s20 }
  0x1e   : > { %p2968_p10 = pnand %p2422_p9, %p2938_p1  ;;  %s2974_s22 = sshll.u32 %s2847_s21, 4  ;;  %s269_s22 = int_to_ptr.vmem [resolvable:$true] %s2974_s22 }
  0x1f   : > { %s3357_s1 = sld [smem:[#allocation18_spill]] }
  0x20   : > { %p2984_p12 = pneg %p2968_p10 }
  0x25   : > { %s2623_s10 = scalar_lea.hbm %s3357_s1, 9216 }
  0x26   : > { %p2624_p11 = scmp.ne.s32.totalorder %s3357_s1, %s2623_s10  ;;  %p2630_p3 = scmp.lt.u32.totalorder %s2623_s10, %s3357_s1 }
  0x28   : > { %p2626_p13 = pnand %p2984_p12, %p2624_p11 }
  0x2a   : > { %p2627_p0 = pneg %p2626_p13 }
  0x2c   : > { %p2632_p5 = pnand %p2630_p3, %p2627_p0 }
  0x2e   : > { %2635 = shalt.err (!%p2632_p5)
}
  0x2f   : > { %s2636_s14 = scalar_lea.vmem %s2962_s17, 9216  ;;  %p2644_p1 = scmp.lt.s32.totalorder %s2962_s17, %s2962_s17 }
  0x30   : > { %p2637_p7 = scmp.ne.s32.totalorder %s2962_s17, %s2636_s14  ;;  %p2645_p4 = scmp.lt.s32.totalorder %s2636_s14, %s2636_s14 }
  0x32   : > { %p2639_p9 = pnand %p2637_p7, %p2984_p12  ;;  %p2646_p11 = por %p2645_p4, %p2644_p1 }
  0x34   : > { %p2640_p6 = pneg %p2639_p9 }
  0x36   : > { %p2647_p13 = pnand %p2646_p11, %p2640_p6 }
  0x38   : > { %2650 = shalt.err (!%p2647_p13)
}
  0x39   : > { %s3341_s23 = smov 64   ;;  %s3342_s9 = smov 4  }
  0x3a   : > { %2425 = dma.hbm_to_vmem [thread:$0]  (!%p2968_p10), %s3357_s1, 9216, %s2962_s17, [#allocation6], %s3341_s23, %s3341_s23, %s3342_s9  }
  0x3b   : > { %s3359_s3 = sld [smem:[#allocation19_spill]] }
  0x41   : > { %s2651_s14 = scalar_lea.hbm %s3359_s3, 3072 }
  0x42   : > { %p2652_p1 = scmp.ne.s32.totalorder %s3359_s3, %s2651_s14  ;;  %p2658_p0 = scmp.lt.u32.totalorder %s2651_s14, %s3359_s3 }
  0x44   : > { %p2654_p4 = pnand %p2652_p1, %p2984_p12 }
  0x46   : > { %p2655_p6 = pneg %p2654_p4 }
  0x48   : > { %p2660_p3 = pnand %p2658_p0, %p2655_p6 }
  0x4a   : > { %2663 = shalt.err (!%p2660_p3)
}
  0x4b   : > { %s2664_s17 = scalar_lea.vmem %s2972_s20, 3072  ;;  %p2672_p11 = scmp.lt.s32.totalorder %s2972_s20, %s2972_s20 }
  0x4c   : > { %p2665_p5 = scmp.ne.s32.totalorder %s2972_s20, %s2664_s17  ;;  %p2673_p13 = scmp.lt.s32.totalorder %s2664_s17, %s2664_s17 }
  0x4e   : > { %p2667_p7 = pnand %p2665_p5, %p2984_p12  ;;  %p2674_p1 = por %p2673_p13, %p2672_p11 }
  0x50   : > { %p2668_p9 = pneg %p2667_p7 }
  0x52   : > { %p2675_p4 = pnand %p2674_p1, %p2668_p9 }
  0x54   : > { %2678 = shalt.err (!%p2675_p4)
}
  0x55   : > { %2428 = dma.hbm_to_vmem [thread:$0]  (!%p2968_p10), %s3359_s3, 3072, %s2972_s20, [#allocation6], %s3341_s23, %s3341_s23, %s3342_s9  }
  0x56   : > { %s2679_s10 = scalar_lea.hbm %s3330_s5, 1024 }
  0x57   : > { %p2680_p6 = scmp.ne.s32.totalorder %s3330_s5, %s2679_s10  ;;  %p2686_p5 = scmp.lt.u32.totalorder %s2679_s10, %s3330_s5 }
  0x59   : > { %p2682_p0 = pnand %p2680_p6, %p2984_p12 }
  0x5b   : > { %p2683_p3 = pneg %p2682_p0 }
  0x5d   : > { %p2688_p7 = pnand %p2686_p5, %p2683_p3 }
  0x5f   : > { %2691 = shalt.err (!%p2688_p7)
}
  0x60   : > { %s2692_s17 = scalar_lea.vmem %s269_s22, 1024  ;;  %p2700_p1 = scmp.lt.s32.totalorder %s269_s22, %s269_s22 }
  0x61   : > { %p2693_p9 = scmp.ne.s32.totalorder %s269_s22, %s2692_s17  ;;  %p2701_p4 = scmp.lt.s32.totalorder %s2692_s17, %s2692_s17 }
  0x63   : > { %p2695_p11 = pnand %p2693_p9, %p2984_p12  ;;  %p2702_p8 = por %p2701_p4, %p2700_p1 }
  0x65   : > { %p2696_p13 = pneg %p2695_p11 }
  0x67   : > { %p2703_p2 = pnand %p2702_p8, %p2696_p13 }
  0x69   : > { %2706 = shalt.err (!%p2703_p2)
}
  0x6a   : > { %2431 = dma.hbm_to_vmem [thread:$0]  (!%p2968_p10), %s3330_s5, 1024, %s269_s22, [#allocation9], %s3341_s23, %s3341_s23, %s3342_s9  }
  0x6b   : > { %s34_s24 = sadd.s32 1, %s2835_s29  ;;  %s37_s18 = sadd.s32 1, %s2839_s30 }
  0x6c   : > { %p35_p2 = scmp.ge.s32.totalorder %s34_s24, 2  ;;  %s46_s6 = sadd.s32 1, %s2823_s26 }
  0x6d   : > { %p53_p8 = scmp.ne.s32.totalorder %s2823_s26, %s2819_s25  ;;  %p54_p12 = scmp.eq.s32.totalorder %s2843_s8, 0 }
  0x6e   : > { %s3384_s24 = smov (%p35_p2, %s34_s24), 0  ;;  %s3386_s18 = smov (!%p35_p2, %s37_s18), %s2839_s30 }
  0x6f   : > { %s42_s7 = ssub.s32 %s2835_s29, %s3384_s24  ;;  %p39_p6 = scmp.ge.s32.totalorder %s3386_s18, 2 }
  0x70   : > { %p3360_p0 = scmp.ne.s32.totalorder %s3351_s12, 0  ;;  %p55_p10 = por %p54_p12, %p53_p8 }
  0x71   : > { %p2443_p5 = scmp.lt.s32.totalorder %s2843_s8, 4  ;;  %s3388_s18 = smov (%p39_p6, %s3386_s18), 0 }
  0x72   : > { %p3069_p3 = por %p3360_p0, %p53_p8  ;;  %s285_s22 = sand.u32 1, %s2823_s26  }
  0x73   : > { %s2403_s10 = smul.u32 3, %s2835_s29  ;;  %s41_s16 = ssub.s32 %s2839_s30, %s3388_s18 }
  0x74   : > { %s43_s19 = sor.u32 %s42_s7, %s41_s16  ;;  %s2402_s21 = smul.u32 12, %s285_s22 }
  0x75   : > { %p44_p7 = scmp.eq.s32.totalorder %s43_s19, 0  ;;  %s2404_s14 = smul.u32 6, %s2839_s30 }
  0x76   : > { %p3081_p9 = pnand %p2443_p5, %p55_p10  ;;  %s289_s4 = scalar_lea.vmem [#allocation2], %s2402_s21 }
  0x77   : > { %s3086_s12 = scalar_select %p44_p7, %s2823_s26, %s46_s6  }
  0x78   : > { %s295_s20 = sadd.s32 %s2404_s14, %s2403_s10  ;;  %s298_s23 = sshll.u32 %s289_s4, 4  ;;  %s3088_s23 = int_to_ptr.vmem [resolvable:$true] %s298_s23 }
  0x79   : > { %s1974_s9 = sshll.u32 %s295_s20, 6  ;;  %s3095_s16 = scalar_lea.sflag [#allocation3], %s285_s22 }
  0x7a   : > { %s3093_s7 = scalar_lea.hbm %s3325_s0, %s1974_s9  ;;  %p2709_p13 = pneg %p3081_p9 }
  0x7b   : > { %s2707_s19 = scalar_lea.hbm %s3093_s7, 192  ;;  %s2712_s1 = scalar_lea.hbm %s3325_s0, 768 }
  0x7c   : > { %p2708_p11 = scmp.ne.s32.totalorder %s3093_s7, %s2707_s19  ;;  %p2713_p2 = scmp.lt.u32.totalorder %s3093_s7, %s3325_s0 }
  0x7d   : > { %p2714_p8 = scmp.lt.u32.totalorder %s2712_s1, %s2707_s19  ;;  %p2716_p6 = scmp.lt.u32.totalorder %s2707_s19, %s3093_s7 }
  0x7e   : > { %p2710_p1 = pnand %p2709_p13, %p2708_p11 }
  0x7f   : > { %p2715_p12 = por %p2714_p8, %p2713_p2 }
  0x80   : > { %p2711_p4 = pneg %p2710_p1 }
  0x81   : > { %p2717_p0 = por %p2716_p6, %p2715_p12 }
  0x83   : > { %p2718_p10 = pnand %p2717_p0, %p2711_p4 }
  0x85   : > { %2721 = shalt.err (!%p2718_p10)
}
  0x86   : > { %s2722_s22 = scalar_lea.vmem %s3088_s23, 192  ;;  %s2850_s21 = smov [#allocation2]  }
  0x87   : > { %p2723_p5 = scmp.ne.s32.totalorder %s3088_s23, %s2722_s22  ;;  %s2727_s14 = sshll.u32 %s2850_s21, 4  ;;  %s2728_s14 = int_to_ptr.vmem [resolvable:$false] %s2727_s14 }
  0x88   : > { %s2729_s20 = scalar_lea.vmem %s2728_s14, 384  ;;  %p2730_p1 = scmp.lt.s32.totalorder %s3088_s23, %s2728_s14 }
  0x89   : > { %p2725_p7 = pnand %p2723_p5, %p2709_p13  ;;  %p2731_p2 = scmp.lt.s32.totalorder %s2729_s20, %s2722_s22 }
  0x8b   : > { %p2726_p11 = pneg %p2725_p7  ;;  %p2732_p8 = por %p2731_p2, %p2730_p1 }
  0x8d   : > { %p2733_p12 = pnand %p2732_p8, %p2726_p11 }
  0x8f   : > { %2736 = shalt.err (!%p2733_p12)
}
  0x90   : > { %s3363_s4 = smov 4   ;;  %s3364_s19 = smov 64  }
  0x91   : > { %2435 = dma.hbm_to_vmem [thread:$0]  (!%p3081_p9), %s3093_s7, 192, %s3088_s23, %s3095_s16, %s3364_s19, %s3364_s19, %s3363_s4  }
  0x92   : > { %p3365_p13 = scmp.ne.s32.totalorder %s3355_s15, 0 }
  0x93   : > { %s3129_s6 = sand.u32 (!%p3365_p13), 1, %s2819_s25   ;;  %p3366_p4 = scmp.ne.s32.totalorder (!%p3365_p13), %s3352_s13, 0 }
  0x94   : > { %310 = sbr.rel (%p3365_p13) target bundleno = 1788 (0x6fc), region = 48  ;;  %s313_s1 = scalar_lea.sflag (!%p3365_p13), [#allocation3], %s3129_s6 }
  0x95   : > { %s2405_s10 = smul.u32 (!%p3365_p13), 12, %s3129_s6 }
  0x97   : > { %s3133_s3 = scalar_lea.vmem (!%p3365_p13), [#allocation2], %s2405_s10 }
  0x9b   : > { %2798 = dma.done.wait (%p3366_p4), %s313_s1, 192  }
  0x9c   : > { %2800 = vsyncadd (%p3366_p4), %s313_s1, 4294967104  ;;  %p3367_p9 = scmp.ne.s32.totalorder %s3350_s11, 0 }
  0x9e   : > { %2802 = dma.done.wait (%p3367_p9), [#allocation6], 12288  }
  0x9f   : > { %2804 = vsyncadd (%p3367_p9), [#allocation6], 4294955008 }
  0xa0   : > { %2806 = dma.done.wait (%p3367_p9), [#allocation9], 1024  }
  0xa1   : > { %2808 = vsyncadd (%p3367_p9), [#allocation9], 4294966272  ;;  %v2519_v0 = vld [vmem:[#allocation5 + $0x40] sm:$0xff]   ;;  %v2521_v2 = vld [vmem:[#allocation5 + $0x48] sm:$0xff]   ;;  %s1980_s13 = sshll.u32 %s2827_s27, 3  ;;  %v368_v4 = vlaneseq  ;;  %v2851_v34 = vmov 0.0  }
  0xa2   : > { %v2520_v1 = vld [vmem:[#allocation5] sm:$0xff]   ;;  %2109 = vmatprep.subr.bf16.mxu0 %v2519_v0  ;;  %v2523_v5 = vld [vmem:[#allocation5 + $0x8] sm:$0xff]   ;;  %v2524_v6 = vld [vmem:[#allocation5 + $0x50] sm:$0xff]   ;;  %s1981_s15 = sadd.s32 4294967288, %s1980_s13  ;;  %s3368_s16 = sld [smem:[#allocation20_spill]]  ;;  %vm2852_vm14 = vmmov 0  }
  0xa3   : > { %2110 = vmatpush3.bf16.msra.mxu0 %v2520_v1  ;;  %v2522_v3 = vld [vmem:[#allocation5 + $0x80] sm:$0xff]   ;;  %v2525_v7 = vld [vmem:[#allocation5 + $0x88] sm:$0xff]   ;;  %v2526_v8 = vld [vmem:[#allocation5 + $0x10] sm:$0xff]   ;;  %v3148_v9 = vshrl.u32 %v368_v4, 7  ;;  %v372_v13 = vstv %s1981_s15  ;;  %s3369_s19 = sld [smem:[#allocation16_spill]]  ;;  %s3370_s17 = sld [smem:[#allocation21_spill]] }
  0xa4   : > { %2111 = vmatprep.subr.bf16.mxu0 %v2521_v2  ;;  %2262 = vmatprep.subr.bf16.mxu1 %v2522_v3  ;;  %v2527_v10 = vld [vmem:[#allocation5 + $0x58] sm:$0xff]   ;;  %v2528_v11 = vld [vmem:[#allocation5 + $0x90] sm:$0xff]   ;;  %v2530_v14 = vld [vmem:[#allocation5 + $0x60] sm:$0xff]   ;;  %s3371_s20 = sld [smem:[#allocation22_spill]]  ;;  %s2853_s10 = smov [#allocation10]  }
  0xa5   : > { %2263 = vmatpush3.bf16.msra.mxu1 %v2522_v3  ;;  %v2529_v12 = vld [vmem:[#allocation5 + $0x18] sm:$0xff]   ;;  %v370_v15 = vadd.s32 8, %v3148_v9  ;;  %v371_v17 = vadd.s32 16, %v3148_v9  ;;  %v373_v18 = vadd.s32 %v372_v13, %v3148_v9  ;;  %v2532_v19 = vld [vmem:[#allocation5 + $0x20] sm:$0xff]   ;;  %v2533_v22 = vld [vmem:[#allocation5 + $0x68] sm:$0xff]   ;;  %vm397_vm9 = vcmp.lt.s32.totalorder %v3148_v9, 1 }
  0xa6   : > { %2264 = vmatprep.subr.bf16.mxu1 %v2525_v7  ;;  %v2531_v16 = vld [vmem:[#allocation5 + $0x98] sm:$0xff]   ;;  %v2534_v20 = vld [vmem:[#allocation5 + $0xa0] sm:$0xff]   ;;  %v2535_v24 = vld [vmem:[#allocation5 + $0x28] sm:$0xff]   ;;  %vm406_vm10 = vcmp.lt.s32.totalorder %v3148_v9, 7  ;;  %vm851_vm11 = vcmp.lt.s32.totalorder %v3148_v9, 6  ;;  %vm842_vm12 = vcmp.lt.s32.totalorder %v3148_v9, 2 }
  0xa7   : > { %2112 = vmatpush3.bf16.msra.mxu0 %v2523_v5  ;;  %v374_v21 = vadd.s32 %v372_v13, %v370_v15  ;;  %v375_v23 = vadd.s32 %v372_v13, %v371_v17  ;;  %vm376_vm0 = vcmp.ge.s32.totalorder %v373_v18, 0  ;;  %vm379_vm1 = vcmp.lt.s32.totalorder %v373_v18, 16  ;;  %v2537_v25 = vld [vmem:[#allocation5 + $0xa8] sm:$0xff]   ;;  %v2536_v26 = vld [vmem:[#allocation5 + $0x70] sm:$0xff]   ;;  %v2539_v28 = vld [vmem:[#allocation5 + $0x78] sm:$0xff]   ;;  %s2741_s1 = sshll.u32 %s2853_s10, 4  ;;  %s2742_s1 = int_to_ptr.vmem [resolvable:$false] %s2741_s1 }
  0xa8   : > { %2113 = vmatprep.subr.bf16.mxu0 %v2524_v6  ;;  %v2538_v27 = vld [vmem:[#allocation5 + $0x30] sm:$0xff]   ;;  %vm382_vm6 = vmand %vm376_vm0, %vm379_vm1  ;;  %v2541_v38 = vld [vmem:[#allocation5 + $0x38] sm:$0xff]   ;;  %vm1291_vm13 = vcmp.lt.s32.totalorder %v3148_v9, 4 }
  0xa9   : > { %2265 = vmatpush3.bf16.msra.mxu1 %v2525_v7  ;;  %vm377_vm2 = vcmp.ge.s32.totalorder %v374_v21, 0  ;;  %vm378_vm3 = vcmp.ge.s32.totalorder %v375_v23, 0  ;;  %vm380_vm4 = vcmp.lt.s32.totalorder %v374_v21, 16  ;;  %v2540_v29 = vld [vmem:[#allocation5 + $0xb0] sm:$0xff]   ;;  %vm381_vm5 = vcmp.lt.s32.totalorder %v375_v23, 16  ;;  %v2542_v43 = vld [vmem:[#allocation5 + $0xb8] sm:$0xff]  }
  0xaa   : > { %2266 = vmatprep.subr.bf16.mxu1 %v2528_v11  ;;  %v3154_v30 = vld [vmem:[%s3133_s3] sm:$0xff]   ;;  %v3159_v31 = vld [vmem:[%s3133_s3 + $0x8] sm:$0xf]  ;;  %vm383_vm7 = vmand %vm377_vm2, %vm380_vm4  ;;  %v3165_v35 = vsel %vm382_vm6, 1.0, %v2851_v34  ;;  %s1979_s3 = sshll.u32 %s3129_s6, 3  ;;  %s2101_s13 = sshll.u32 %s3369_s19, 1 }
  0xab   : > { %2114 = vmatpush3.bf16.msra.mxu0 %v2526_v8  ;;  %v2107_v32 = vunpack.c.l.bf16 %v3154_v30  ;;  %v2108_v33 = vunpack.c.h.bf16 %v3154_v30  ;;  %v365_v36 = vunpack.c.l.bf16 %v3159_v31  ;;  %v3169_v37 = vsel %vm383_vm7, 1.0, %v2851_v34  ;;  %vm384_vm8 = vmand %vm378_vm3, %vm381_vm5  ;;  %v2543_v48 = vld [vmem:[#allocation7] sm:$0xff]   ;;  %v2544_v57 = vld [vmem:[#allocation7 + $0x8] sm:$0xff]   ;;  %s1848_s15 = sadd.s32 %s2827_s27, %s2101_s13  ;;  %s358_s9 = scalar_lea.vmem [#allocation10], %s1979_s3 }
  0xac   : > { %2115 = vmatprep.subr.bf16.mxu0 %v2527_v10  ;;  %v3180_v41 = vsel %vm384_vm8, 1.0, %v2851_v34  ;;  %v2545_v63 = vld [vmem:[#allocation7 + $0x10] sm:$0xff]   ;;  %v2546_v1 = vld [vmem:[#allocation7 + $0x18] sm:$0xff]   ;;  %v2547_v2 = vld [vmem:[#allocation7 + $0x20] sm:$0xff]   ;;  %s2102_s7 = sshll.u32 %s1848_s15, 7  ;;  %s1852_s22 = sshll.u32 %s358_s9, 4  ;;  %s3273_s22 = int_to_ptr.vmem [resolvable:$true] %s1852_s22 }
  0xad   : > { %2267 = vmatpush3.bf16.msra.mxu1 %v2528_v11  ;;  %v391_v39 = vmul.f32 %v2107_v32, %v3165_v35  ;;  %v392_v40 = vmul.f32 %v2108_v33, %v3169_v37  ;;  %v393_v42 = vmul.f32 %v3180_v41, %v365_v36  ;;  %v2548_v3 = vld [vmem:[#allocation7 + $0x28] sm:$0xff]   ;;  %v2549_v4 = vld [vmem:[#allocation7 + $0x30] sm:$0xff]   ;;  %v2550_v5 = vld [vmem:[#allocation7 + $0x38] sm:$0xff]   ;;  %s3271_s4 = scalar_lea.hbm %s3371_s20, %s2102_s7  ;;  %s1837_s27 = scalar_lea.sflag [#allocation4], %s3129_s6 }
  0xae   : > { %2268 = vmatprep.subr.bf16.mxu1 %v2531_v16  ;;  %v2551_v6 = vld [vmem:[#allocation5 + $0x100] sm:$0xff]   ;;  %v2554_v10 = vld [vmem:[#allocation5 + $0x108] sm:$0xff]   ;;  %v2558_v13 = vld [vmem:[#allocation5 + $0xd0] sm:$0xff]   ;;  %s2737_s19 = scalar_lea.vmem %s3273_s22, 128  ;;  %s2743_s3 = scalar_lea.vmem %s2742_s1, 256 }
  0xaf   : > { %2116 = vmatpush3.bf16.msra.mxu0 %v2529_v12  ;;  %v394_v44 = vrot.slane %v391_v39, 7  ;;  %v395_v45 = vrot.slane %v392_v40, 7  ;;  %v412_v46 = vpack.c.bf16 %v392_v40, %v391_v39  ;;  %v403_v47 = vrot.slane %v391_v39, 1  ;;  %v2552_v7 = vld [vmem:[#allocation5 + $0xc0] sm:$0xff]   ;;  %v2555_v11 = vld [vmem:[#allocation5 + $0xc8] sm:$0xff]   ;;  %v2557_v12 = vld [vmem:[#allocation5 + $0x110] sm:$0xff]   ;;  %p2738_p6 = scmp.ne.s32.totalorder %s3273_s22, %s2737_s19  ;;  %p2744_p5 = scmp.lt.s32.totalorder %s3273_s22, %s2742_s1 }
  0xb0   : > { %2117 = vmatprep.subr.bf16.mxu0 %v2530_v14  ;;  %v396_v49 = vrot.slane %v393_v42, 7  ;;  %v404_v50 = vrot.slane %v392_v40, 1  ;;  %v405_v51 = vrot.slane %v393_v42, 1  ;;  %v413_v53 = vpack.c.bf16 %v393_v42, %v393_v42  ;;  %v2553_v8 = vld [vmem:[#allocation5 + $0x140] sm:$0xff]   ;;  %v2560_v14 = vld [vmem:[#allocation5 + $0x118] sm:$0xff]   ;;  %v2609_v9 = vld [vmem:[#allocation7 + $0x90] sm:$0xff]   ;;  %p2745_p7 = scmp.lt.s32.totalorder %s2743_s3, %s2737_s19 }
  0xb1   : > { %2269 = vmatpush3.bf16.msra.mxu1 %v2531_v16  ;;  %645 = vmatprep.mubr.bf16.mxu0 %v412_v46  ;;  %v399_v52 = vsel %vm397_vm9, %v394_v44, %v395_v45  ;;  %v2561_v15 = vld [vmem:[#allocation5 + $0xd8] sm:$0xff]   ;;  %v2563_v16 = vld [vmem:[#allocation5 + $0x120] sm:$0xff]   ;;  %p2739_p0 = pnand %p2738_p6, %p3069_p3 }
  0xb2   : > { %2270 = vmatprep.subr.bf16.mxu1 %v2534_v20  ;;  %v400_v54 = vsel %vm397_vm9, %v396_v49, %v394_v44  ;;  %v407_v55 = vsel %vm406_vm10, %v404_v50, %v405_v51  ;;  %v408_v56 = vsel %vm406_vm10, %v403_v47, %v404_v50  ;;  %v409_v60 = vsel %vm406_vm10, %v405_v51, %v403_v47  ;;  %p2746_p11 = por %p2745_p7, %p2744_p5 }
  0xb3   : > { %2118 = vmatpush3.bf16.msra.mxu0 %v2532_v19  ;;  %v401_v58 = vpack.c.bf16 %v399_v52, %v400_v54  ;;  %v410_v59 = vpack.c.bf16 %v407_v55, %v408_v56  ;;  %v411_v61 = vpack.c.bf16 %v409_v60, %v409_v60  ;;  %v398_v62 = vsel %vm397_vm9, %v395_v45, %v396_v49  ;;  %v1985_v19 = vld [vmem:[%s3327_s2] ss:$0 sm:$0xff]  ;;  %v2559_v54 = vld [vmem:[#allocation5 + $0x150] sm:$0xff]   ;;  %v2562_v55 = vld [vmem:[#allocation5 + $0x158] sm:$0xff]   ;;  %p2740_p10 = pneg %p2739_p0 }
  0xb4   : > { %2119 = vmatprep.subr.bf16.mxu0 %v2533_v22  ;;  %v402_v0 = vpack.c.bf16 %v398_v62, %v398_v62  ;;  %v2564_v56 = vld [vmem:[#allocation5 + $0xe0] sm:$0xff]   ;;  %v2568_v60 = vld [vmem:[#allocation5 + $0x168] sm:$0xff]   ;;  %v2570_v62 = vld [vmem:[#allocation5 + $0xf0] sm:$0xff]  }
  0xb5   : > { %2271 = vmatpush3.bf16.msra.mxu1 %v2534_v20  ;;  %2278 = vmatprep.mubr.bf16.mxu1 %v410_v59  ;;  %v2567_v59 = vld [vmem:[#allocation5 + $0xe8] sm:$0xff]   ;;  %p2747_p1 = pnand %p2746_p11, %p2740_p10 }
  0xb6   : > { %2272 = vmatprep.subr.bf16.mxu1 %v2537_v25 }
  0xb7   : > { %2120 = vmatpush3.bf16.msra.mxu0 %v2535_v24 }
  0xb8   : > { %2121 = vmatprep.subr.bf16.mxu0 %v2536_v26 }
  0xb9   : > { %2273 = vmatpush3.bf16.msra.mxu1 %v2537_v25 }
  0xba   : > { %2274 = vmatprep.subr.bf16.mxu1 %v2540_v29 }
  0xbb   : > { %2122 = vmatpush3.bf16.msra.mxu0 %v2538_v27 }
  0xbc   : > { %2123 = vmatprep.subr.bf16.mxu0 %v2539_v28 }
  0xbd   : > { %2275 = vmatpush3.bf16.msra.mxu1 %v2540_v29 }
  0xbe   : > { %2276 = vmatprep.subr.bf16.mxu1 %v2542_v43 }
  0xbf   : > { %2124 = vmatpush3.bf16.msra.mxu0 %v2541_v38 }
  0xc0   : > { %2282 = vmatprep.subr.bf16.mxu0 %v2543_v48 }
  0xc1   : > { %2277 = vmatpush3.bf16.msra.mxu1 %v2542_v43 }
  0xc2   : > { %646 = vmatmul.mubr.bf16.vlgmr.msra.gmra.mrb[0].mxu0 %v401_v58  ;;  %2157 = vmatprep.subr.bf16.mxu1 %v2551_v6  ;;  %v2566_v58 = vld [vmem:[#allocation5 + $0x128] sm:$0xff]  }
  0xc3   : > { %653 = vmatprep.mubr.bf16.mxu0 %v413_v53  ;;  %2283 = vmatpush3.bf16.msra.mxu0 %v2543_v48  ;;  %v2556_v53 = vld [vmem:[#allocation5 + $0x148] sm:$0xff]  }
  0xc4   : > { %2279 = vmatmul.mubr.bf16.vlgmr.msra.gmra.mrb[0].mxu1 %v411_v61  ;;  %2284 = vmatprep.subr.bf16.mxu0 %v2544_v57  ;;  %v2569_v61 = vld [vmem:[#allocation5 + $0x130] sm:$0xff]  }
  0xc5   : > { %2158 = vmatpush3.bf16.msra.mxu1 %v2552_v7 }
  0xc6   : > { %2159 = vmatprep.subr.bf16.mxu1 %v2554_v10 }
  0xc7   : > { %2285 = vmatpush3.bf16.msra.mxu0 %v2544_v57  ;;  %v2565_v57 = vld [vmem:[#allocation5 + $0x160] sm:$0xff]  }
  0xc8   : > { %2286 = vmatprep.subr.bf16.mxu0 %v2545_v63 }
  0xc9   : > { %2160 = vmatpush3.bf16.msra.mxu1 %v2555_v11 }
  0xca   : > { %654 = vmatmul.mubr.bf16.gmra.mrb[4].mxu0 %v402_v0  ;;  %2161 = vmatprep.subr.bf16.mxu1 %v2557_v12  ;;  %v2572_v0 = vld [vmem:[#allocation5 + $0x138] sm:$0xff]  }
  0xcb   : > { %2287 = vmatpush3.bf16.msra.mxu0 %v2545_v63  ;;  %v2571_v63 = vld [vmem:[#allocation5 + $0x170] sm:$0xff]  }
  0xcc   : > { %2288 = vmatprep.subr.bf16.mxu0 %v2546_v1 }
  0xcd   : > { %2162 = vmatpush3.bf16.msra.mxu1 %v2558_v13 }
  0xce   : > { %2163 = vmatprep.subr.bf16.mxu1 %v2560_v14 }
  0xcf   : > { %2289 = vmatpush3.bf16.msra.mxu0 %v2546_v1  ;;  %v2573_v1 = vld [vmem:[#allocation5 + $0xf8] sm:$0xff]  }
  0xd0   : > { %2290 = vmatprep.subr.bf16.mxu0 %v2547_v2 }
  0xd1   : > { %2164 = vmatpush3.bf16.msra.mxu1 %v2561_v15 }
  0xd2   : > { %2165 = vmatprep.subr.bf16.mxu1 %v2563_v16 }
  0xd3   : > { %2291 = vmatpush3.bf16.msra.mxu0 %v2547_v2  ;;  %v2574_v2 = vld [vmem:[#allocation5 + $0x178] sm:$0xff]  }
  0xd4   : > { %2292 = vmatprep.subr.bf16.mxu0 %v2548_v3 }
  0xd5   : > { %2166 = vmatpush3.bf16.msra.mxu1 %v2564_v56  ;;  %v2593_v56 = vld [vmem:[#allocation5 + $0x198] sm:$0xff]  }
  0xd6   : > { %2167 = vmatprep.subr.bf16.mxu1 %v2566_v58 }
  0xd7   : > { %2293 = vmatpush3.bf16.msra.mxu0 %v2548_v3  ;;  %v2575_v3 = vld [vmem:[#allocation7 + $0x40] sm:$0xff]  }
  0xd8   : > { %2294 = vmatprep.subr.bf16.mxu0 %v2549_v4 }
  0xd9   : > { %2168 = vmatpush3.bf16.msra.mxu1 %v2567_v59 }
  0xda   : > { %2169 = vmatprep.subr.bf16.mxu1 %v2569_v61  ;;  %v2020_v61 = vld [vmem:[%s3327_s2 + $0x1] ss:$0 sm:$0xff] }
  0xdb   : > { %2295 = vmatpush3.bf16.msra.mxu0 %v2549_v4  ;;  %v2010_v4 = vld [vmem:[%s3368_s16] ss:$0 sm:$0xff] }
  0xdc   : > { %2296 = vmatprep.subr.bf16.mxu0 %v2550_v5 }
  0xdd   : > { %2170 = vmatpush3.bf16.msra.mxu1 %v2570_v62 }
  0xde   : > { %2171 = vmatprep.subr.bf16.mxu1 %v2572_v0 }
  0xdf   : > { %2297 = vmatpush3.bf16.msra.mxu0 %v2550_v5 }
  0xe0   : > { %2302 = vmatprep.subr.bf16.mxu0 %v2553_v8 }
  0xe1   : > { %2172 = vmatpush3.bf16.msra.mxu1 %v2573_v1 }
  0xe2   : > { %2322 = vmatprep.subr.bf16.mxu1 %v2575_v3 }
 0x195   : > { %v2125_v17 = vpop.f32.mrb[0].mxu0 }
 0x196   : > { %v2126_v18 = vpop.f32.mrb[1].mxu0 }
 0x197   : > { %v2127_v20 = vadd.f32 %v2126_v18, %v2125_v17  ;;  %v2128_v21 = vpop.f32.mrb[2].mxu0  ;;  %v2280_v23 = vpop.f32.mrb[0].mxu1 }
 0x198   : > { %v2129_v22 = vpop.f32.mrb[3].mxu0  ;;  %v695_v26 = vpop.f32.mrb[1].mxu1 }
 0x199   : > { %v2130_v24 = vadd.f32 %v2129_v22, %v2128_v21  ;;  %v648_v25 = vadd.f32 %v2127_v20, %v1985_v19  ;;  %v2281_v27 = vpop.f32.mrb[2].mxu1 }
 0x19a   : > { %v698_v38 = vpop.f32.mrb[3].mxu1 }
 0x19b   : > { %v696_v28 = vadd.f32 %v695_v26, %v648_v25  ;;  %v651_v29 = vadd.f32 %v2130_v24, %v1985_v19 }
 0x19d   : > { %v699_v39 = vadd.f32 %v698_v38, %v651_v29  ;;  %v2131_v40 = vpop.f32.mrb[4].mxu0  ;;  %v709_v43 = vmax.f32 %v696_v28, 0.0  ;;  %v2576_v38 = vld [vmem:[#allocation7 + $0x48] sm:$0xff]  }
 0x19e   : > { %v2132_v42 = vpop.f32.mrb[5].mxu0 }
 0x19f   : > { %v710_v44 = vmax.f32 %v699_v39, 0.0  ;;  %v2133_v45 = vadd.f32 %v2132_v42, %v2131_v40  ;;  %v2134_v46 = vpop.f32.mrb[6].mxu0  ;;  %v2577_v40 = vld [vmem:[#allocation7 + $0x50] sm:$0xff]  }
 0x1a0   : > { %v2135_v47 = vpop.f32.mrb[7].mxu0  ;;  %v2581_v46 = vld [vmem:[#allocation7 + $0x70] sm:$0xff]  }
 0x1a1   : > { %v712_v48 = vpack.c.bf16 %v710_v44, %v709_v43  ;;  %v656_v49 = vadd.f32 %v2133_v45, %v1985_v19  ;;  %v2578_v43 = vld [vmem:[#allocation7 + $0x58] sm:$0xff]   ;;  %v2579_v44 = vld [vmem:[#allocation7 + $0x60] sm:$0xff]   ;;  %v2580_v45 = vld [vmem:[#allocation7 + $0x68] sm:$0xff]  }
 0x1a2   : > { %v2582_v47 = vld [vmem:[#allocation7 + $0x78] sm:$0xff]  }
 0x1a3   : > { %v704_v50 = vadd.f32 %v2280_v23, %v656_v49  ;;  %2298 = vmatprep.mubr.bf16.mxu0 %v712_v48  ;;  %v2583_v48 = vld [vmem:[#allocation5 + $0x1c0] sm:$0xff]  }
 0x1a4   : > { %v2584_v49 = vld [vmem:[#allocation5 + $0x180] sm:$0xff]  }
 0x1a5   : > { %v711_v51 = vmax.f32 %v704_v50, 0.0  ;;  %v2585_v50 = vld [vmem:[#allocation5 + $0x200] sm:$0xff]  }
 0x1a7   : > { %v713_v52 = vpack.c.bf16 %v711_v51, %v711_v51  ;;  %v2586_v51 = vld [vmem:[#allocation5 + $0x1c8] sm:$0xff]  }
 0x1a9   : > { %2299 = vmatmul.mubr.bf16.vlgmr.msra.gmra.mrb[8].mxu0 %v713_v52  ;;  %v2587_v52 = vld [vmem:[#allocation5 + $0x188] sm:$0xff]  }
 0x1aa   : > { %2303 = vmatpush3.bf16.msra.mxu0 %v2553_v8 }
 0x1ab   : > { %2304 = vmatprep.subr.bf16.mxu0 %v2556_v53 }
 0x1ae   : > { %2305 = vmatpush3.bf16.msra.mxu0 %v2556_v53  ;;  %v2589_v53 = vld [vmem:[#allocation5 + $0x1d0] sm:$0xff]  }
 0x1af   : > { %2306 = vmatprep.subr.bf16.mxu0 %v2559_v54 }
 0x1b2   : > { %2307 = vmatpush3.bf16.msra.mxu0 %v2559_v54  ;;  %v2590_v54 = vld [vmem:[#allocation5 + $0x190] sm:$0xff]  }
 0x1b3   : > { %2308 = vmatprep.subr.bf16.mxu0 %v2562_v55 }
 0x1b6   : > { %2309 = vmatpush3.bf16.msra.mxu0 %v2562_v55  ;;  %v2592_v55 = vld [vmem:[#allocation5 + $0x1d8] sm:$0xff]  }
 0x1b7   : > { %2310 = vmatprep.subr.bf16.mxu0 %v2565_v57 }
 0x1ba   : > { %2311 = vmatpush3.bf16.msra.mxu0 %v2565_v57  ;;  %v2595_v57 = vld [vmem:[#allocation5 + $0x1e0] sm:$0xff]  }
 0x1bb   : > { %2312 = vmatprep.subr.bf16.mxu0 %v2568_v60 }
 0x1be   : > { %2313 = vmatpush3.bf16.msra.mxu0 %v2568_v60 }
 0x1bf   : > { %2314 = vmatprep.subr.bf16.mxu0 %v2571_v63 }
 0x1c2   : > { %2315 = vmatpush3.bf16.msra.mxu0 %v2571_v63 }
 0x1c3   : > { %2316 = vmatprep.subr.bf16.mxu0 %v2574_v2 }
 0x1c6   : > { %2317 = vmatpush3.bf16.msra.mxu0 %v2574_v2 }
 0x1c7   : > { %2205 = vmatprep.subr.bf16.mxu0 %v2583_v48 }
 0x27c   : > { %v2300_v5 = vpop.f32.mrb[8].mxu0 }
 0x27d   : > { %v828_v6 = vadd.f32 %v2300_v5, %v2010_v4  ;;  %v819_v7 = vpop.f32.mrb[9].mxu0 }
 0x27e   : > { %v820_v8 = vadd.f32 %v2010_v4, %v819_v7  ;;  %v2301_v10 = vpop.f32.mrb[10].mxu0 }
 0x27f   : > { %v3206_v11 = vadd.f32 %v828_v6, %v365_v36  ;;  %v822_v12 = vpop.f32.mrb[11].mxu0 }
 0x280   : > { %v3210_v13 = vadd.f32 %v2107_v32, %v820_v8  ;;  %v823_v14 = vadd.f32 %v2010_v4, %v822_v12 }
 0x281   : > { %v838_v15 = vmul.f32 %v3180_v41, %v3206_v11 }
 0x282   : > { %v836_v16 = vmul.f32 %v3165_v35, %v3210_v13  ;;  %v3218_v17 = vadd.f32 %v2108_v33, %v823_v14 }
 0x283   : > { %v850_v18 = vrot.slane %v838_v15, 2  ;;  %v841_v31 = vrot.slane %v838_v15, 6  ;;  %v858_v28 = vpack.c.bf16 %v838_v15, %v838_v15 }
 0x284   : > { %v839_v36 = vrot.slane %v836_v16, 6  ;;  %v848_v19 = vrot.slane %v836_v16, 2  ;;  %v837_v32 = vmul.f32 %v3169_v37, %v3218_v17 }
 0x286   : > { %v840_v20 = vrot.slane %v837_v32, 6  ;;  %v849_v21 = vrot.slane %v837_v32, 2  ;;  %v857_v22 = vpack.c.bf16 %v837_v32, %v836_v16  ;;  %v854_v23 = vsel %vm851_vm11, %v850_v18, %v848_v19 }
 0x287   : > { %v845_v33 = vsel %vm842_vm12, %v841_v31, %v839_v36  ;;  %v856_v29 = vpack.c.bf16 %v854_v23, %v854_v23  ;;  %v2591_v23 = vld [vmem:[#allocation5 + $0x210] sm:$0xff]  }
 0x288   : > { %1092 = vmatprep.mubr.bf16.mxu1 %v857_v22  ;;  %v844_v30 = vsel %vm842_vm12, %v839_v36, %v840_v20  ;;  %v852_v24 = vsel %vm851_vm11, %v849_v21, %v850_v18  ;;  %v853_v25 = vsel %vm851_vm11, %v848_v19, %v849_v21  ;;  %v843_v39 = vsel %vm842_vm12, %v840_v20, %v841_v31  ;;  %v2588_v22 = vld [vmem:[#allocation5 + $0x208] sm:$0xff]  }
 0x289   : > { %v846_v26 = vpack.c.bf16 %v844_v30, %v845_v33  ;;  %v855_v27 = vpack.c.bf16 %v852_v24, %v853_v25  ;;  %v847_v42 = vpack.c.bf16 %v843_v39, %v843_v39  ;;  %v2594_v30 = vld [vmem:[#allocation5 + $0x218] sm:$0xff]   ;;  %v2596_v33 = vld [vmem:[#allocation5 + $0x1a0] sm:$0xff]   ;;  %v2598_v25 = vld [vmem:[#allocation5 + $0x1e8] sm:$0xff]  }
 0x28a   : > { %v2597_v24 = vld [vmem:[#allocation5 + $0x220] sm:$0xff]   ;;  %v2604_v39 = vld [vmem:[#allocation5 + $0x1f8] sm:$0xff]  }
 0x28b   : > { %1093 = vmatmul.mubr.bf16.vlgmr.msra.gmra.mrb[4].mxu1 %v846_v26  ;;  %2318 = vmatprep.mubr.bf16.mxu0 %v855_v27  ;;  %v2599_v26 = vld [vmem:[#allocation5 + $0x1a8] sm:$0xff]  }
 0x28c   : > { %1100 = vmatprep.mubr.bf16.mxu1 %v858_v28  ;;  %2319 = vmatmul.mubr.bf16.vlgmr.msra.gmra.mrb[12].mxu0 %v856_v29  ;;  %v2600_v27 = vld [vmem:[#allocation5 + $0x228] sm:$0xff]   ;;  %v2601_v28 = vld [vmem:[#allocation5 + $0x1f0] sm:$0xff]  }
 0x28d   : > { %2323 = vmatpush3.bf16.msra.mxu1 %v2575_v3  ;;  %2206 = vmatpush3.bf16.msra.mxu0 %v2584_v49  ;;  %v2602_v29 = vld [vmem:[#allocation5 + $0x1b0] sm:$0xff]  }
 0x28e   : > { %2324 = vmatprep.subr.bf16.mxu1 %v2576_v38  ;;  %2207 = vmatprep.subr.bf16.mxu0 %v2586_v51 }
 0x291   : > { %2325 = vmatpush3.bf16.msra.mxu1 %v2576_v38  ;;  %2208 = vmatpush3.bf16.msra.mxu0 %v2587_v52  ;;  %v2603_v38 = vld [vmem:[#allocation5 + $0x230] sm:$0xff]  }
 0x292   : > { %2326 = vmatprep.subr.bf16.mxu1 %v2577_v40  ;;  %2209 = vmatprep.subr.bf16.mxu0 %v2589_v53 }
 0x293   : > { %1101 = vmatmul.mubr.bf16.gmra.mrb[8].mxu1 %v847_v42  ;;  %v2606_v42 = vld [vmem:[#allocation5 + $0x238] sm:$0xff]  }
 0x295   : > { %2327 = vmatpush3.bf16.msra.mxu1 %v2577_v40  ;;  %2210 = vmatpush3.bf16.msra.mxu0 %v2590_v54  ;;  %v2605_v40 = vld [vmem:[#allocation5 + $0x1b8] sm:$0xff]  }
 0x296   : > { %2328 = vmatprep.subr.bf16.mxu1 %v2578_v43  ;;  %2211 = vmatprep.subr.bf16.mxu0 %v2592_v55 }
 0x299   : > { %2329 = vmatpush3.bf16.msra.mxu1 %v2578_v43  ;;  %2212 = vmatpush3.bf16.msra.mxu0 %v2593_v56  ;;  %v2607_v43 = vld [vmem:[#allocation7 + $0x80] sm:$0xff]  }
 0x29a   : > { %2330 = vmatprep.subr.bf16.mxu1 %v2579_v44  ;;  %2213 = vmatprep.subr.bf16.mxu0 %v2595_v57 }
 0x29d   : > { %2331 = vmatpush3.bf16.msra.mxu1 %v2579_v44  ;;  %2214 = vmatpush3.bf16.msra.mxu0 %v2596_v33  ;;  %v2046_v44 = vld [vmem:[%s3368_s16 + $0x1] ss:$0 sm:$0xff] }
 0x29e   : > { %2332 = vmatprep.subr.bf16.mxu1 %v2580_v45  ;;  %2215 = vmatprep.subr.bf16.mxu0 %v2598_v25 }
 0x2a1   : > { %2333 = vmatpush3.bf16.msra.mxu1 %v2580_v45  ;;  %2216 = vmatpush3.bf16.msra.mxu0 %v2599_v26 }
 0x2a2   : > { %2334 = vmatprep.subr.bf16.mxu1 %v2581_v46  ;;  %2217 = vmatprep.subr.bf16.mxu0 %v2601_v28 }
 0x2a5   : > { %2335 = vmatpush3.bf16.msra.mxu1 %v2581_v46  ;;  %2218 = vmatpush3.bf16.msra.mxu0 %v2602_v29 }
 0x2a6   : > { %2336 = vmatprep.subr.bf16.mxu1 %v2582_v47  ;;  %2219 = vmatprep.subr.bf16.mxu0 %v2604_v39 }
 0x2a9   : > { %2337 = vmatpush3.bf16.msra.mxu1 %v2582_v47  ;;  %2220 = vmatpush3.bf16.msra.mxu0 %v2605_v40 }
 0x2aa   : > { %2342 = vmatprep.subr.bf16.mxu1 %v2585_v50  ;;  %2362 = vmatprep.subr.bf16.mxu0 %v2607_v43 }
 0x35e   : > { %v2173_v58 = vpop.f32.mrb[4].mxu1 }
 0x35f   : > { %v2174_v59 = vpop.f32.mrb[5].mxu1  ;;  %v2320_v60 = vpop.f32.mrb[12].mxu0 }
 0x360   : > { %v2175_v62 = vadd.f32 %v2174_v59, %v2173_v58  ;;  %v2176_v63 = vpop.f32.mrb[6].mxu1  ;;  %v1142_v0 = vpop.f32.mrb[13].mxu0 }
 0x361   : > { %v2177_v1 = vpop.f32.mrb[7].mxu1  ;;  %v2321_v2 = vpop.f32.mrb[14].mxu0 }
 0x362   : > { %v1095_v3 = vadd.f32 %v2175_v62, %v2020_v61  ;;  %v2178_v4 = vadd.f32 %v2177_v1, %v2176_v63  ;;  %v1145_v5 = vpop.f32.mrb[15].mxu0  ;;  %v2608_v1 = vld [vmem:[#allocation7 + $0x88] sm:$0xff]   ;;  %v2611_v2 = vld [vmem:[#allocation7 + $0xa0] sm:$0xff]  }
 0x364   : > { %v1143_v6 = vadd.f32 %v1142_v0, %v1095_v3  ;;  %v1098_v7 = vadd.f32 %v2178_v4, %v2020_v61  ;;  %v2612_v3 = vld [vmem:[#allocation7 + $0xa8] sm:$0xff]   ;;  %v2613_v4 = vld [vmem:[#allocation7 + $0xb0] sm:$0xff]  }
 0x366   : > { %v1146_v8 = vadd.f32 %v1145_v5, %v1098_v7  ;;  %v2179_v10 = vpop.f32.mrb[8].mxu1  ;;  %v1156_v14 = vmax.f32 %v1143_v6, 0.0  ;;  %v2614_v5 = vld [vmem:[#allocation7 + $0xb8] sm:$0xff]   ;;  %v2615_v6 = vld [vmem:[#allocation8] sm:$0xff]   ;;  %v2616_v7 = vld [vmem:[#allocation8 + $0x8] sm:$0xff]  }
 0x367   : > { %v2180_v12 = vpop.f32.mrb[9].mxu1 }
 0x368   : > { %v1157_v15 = vmax.f32 %v1146_v8, 0.0  ;;  %v2181_v16 = vadd.f32 %v2180_v12, %v2179_v10  ;;  %v2182_v18 = vpop.f32.mrb[10].mxu1  ;;  %v2617_v8 = vld [vmem:[#allocation8 + $0x10] sm:$0xff]   ;;  %v2618_v10 = vld [vmem:[#allocation8 + $0x18] sm:$0xff]   ;;  %v2619_v12 = vld [vmem:[#allocation8 + $0x20] sm:$0xff]  }
 0x369   : > { %v2183_v31 = vpop.f32.mrb[11].mxu1 }
 0x36a   : > { %v1159_v36 = vpack.c.bf16 %v1157_v15, %v1156_v14  ;;  %v1103_v19 = vadd.f32 %v2181_v16, %v2020_v61  ;;  %v2620_v14 = vld [vmem:[#allocation8 + $0x28] sm:$0xff]  }
 0x36b   : > { %v2056_v31 = vld [vmem:[%s3327_s2 + $0x2] ss:$0 sm:$0xff] }
 0x36c   : > { %v1151_v32 = vadd.f32 %v2320_v60, %v1103_v19  ;;  %2338 = vmatprep.mubr.bf16.mxu1 %v1159_v36 }
 0x36e   : > { %v1158_v20 = vmax.f32 %v1151_v32, 0.0 }
 0x370   : > { %v1160_v21 = vpack.c.bf16 %v1158_v20, %v1158_v20 }
 0x372   : > { %2339 = vmatmul.mubr.bf16.vlgmr.msra.gmra.mrb[12].mxu1 %v1160_v21 }
 0x373   : > { %2343 = vmatpush3.bf16.msra.mxu1 %v2585_v50 }
 0x374   : > { %2344 = vmatprep.subr.bf16.mxu1 %v2588_v22 }
 0x377   : > { %2345 = vmatpush3.bf16.msra.mxu1 %v2588_v22 }
 0x378   : > { %2346 = vmatprep.subr.bf16.mxu1 %v2591_v23 }
 0x37b   : > { %2347 = vmatpush3.bf16.msra.mxu1 %v2591_v23 }
 0x37c   : > { %2348 = vmatprep.subr.bf16.mxu1 %v2594_v30 }
 0x37f   : > { %2349 = vmatpush3.bf16.msra.mxu1 %v2594_v30 }
 0x380   : > { %2350 = vmatprep.subr.bf16.mxu1 %v2597_v24 }
 0x383   : > { %2351 = vmatpush3.bf16.msra.mxu1 %v2597_v24 }
 0x384   : > { %2352 = vmatprep.subr.bf16.mxu1 %v2600_v27 }
 0x387   : > { %2353 = vmatpush3.bf16.msra.mxu1 %v2600_v27 }
 0x388   : > { %2354 = vmatprep.subr.bf16.mxu1 %v2603_v38 }
 0x38b   : > { %2355 = vmatpush3.bf16.msra.mxu1 %v2603_v38 }
 0x38c   : > { %2356 = vmatprep.subr.bf16.mxu1 %v2606_v42 }
 0x38f   : > { %2357 = vmatpush3.bf16.msra.mxu1 %v2606_v42 }
 0x390   : > { %2382 = vmatprep.subr.bf16.mxu1 %v2851_v34 }
 0x445   : > { %v2340_v45 = vpop.f32.mrb[12].mxu1 }
 0x446   : > { %v1277_v46 = vadd.f32 %v2340_v45, %v2046_v44  ;;  %v1268_v47 = vpop.f32.mrb[13].mxu1 }
 0x447   : > { %v1269_v48 = vadd.f32 %v2046_v44, %v1268_v47  ;;  %v2341_v49 = vpop.f32.mrb[14].mxu1  ;;  %v2621_v47 = vld [vmem:[#allocation8 + $0x30] sm:$0xff]  }
 0x448   : > { %v1284_v50 = vadd.f32 %v1277_v46, %v3206_v11  ;;  %v1271_v51 = vpop.f32.mrb[15].mxu1 }
 0x449   : > { %v1282_v52 = vadd.f32 %v1269_v48, %v3210_v13  ;;  %v1272_v53 = vadd.f32 %v2046_v44, %v1271_v51  ;;  %v2622_v48 = vld [vmem:[#allocation8 + $0x38] sm:$0xff]   ;;  %v2082_v51 = vld [vmem:[%s3368_s16 + $0x2] ss:$0 sm:$0xff] }
 0x44a   : > { %v1287_v54 = vmul.f32 %v3180_v41, %v1284_v50 }
 0x44b   : > { %v1285_v55 = vmul.f32 %v3165_v35, %v1282_v52  ;;  %v3242_v56 = vadd.f32 %v1272_v53, %v3218_v17 }
 0x44c   : > { %v1290_v57 = vrot.slane %v1287_v54, 4  ;;  %v1300_v0 = vpack.c.bf16 %v1287_v54, %v1287_v54 }
 0x44d   : > { %v1288_v58 = vrot.slane %v1285_v55, 4  ;;  %v1286_v59 = vmul.f32 %v3169_v37, %v3242_v56  ;;  %v2610_v37 = vld [vmem:[#allocation7 + $0x98] sm:$0xff]  }
 0x44f   : > { %v1289_v60 = vrot.slane %v1286_v59, 4  ;;  %v1299_v11 = vpack.c.bf16 %v1286_v59, %v1285_v55  ;;  %v1294_v61 = vsel %vm1291_vm13, %v1290_v57, %v1288_v58 }
 0x450   : > { %v1298_v35 = vpack.c.bf16 %v1294_v61, %v1294_v61 }
 0x451   : > { %1534 = vmatprep.mubr.bf16.mxu0 %v1299_v11  ;;  %v1293_v13 = vsel %vm1291_vm13, %v1288_v58, %v1289_v60  ;;  %v1292_v62 = vsel %vm1291_vm13, %v1289_v60, %v1290_v57 }
 0x452   : > { %v1295_v63 = vpack.c.bf16 %v1293_v13, %v1294_v61  ;;  %v1297_v41 = vpack.c.bf16 %v1292_v62, %v1293_v13  ;;  %v1296_v17 = vpack.c.bf16 %v1292_v62, %v1292_v62 }
 0x454   : > { %1535 = vmatmul.mubr.bf16.vlgmr.msra.gmra.mrb[16].mxu0 %v1295_v63  ;;  %2358 = vmatprep.mubr.bf16.mxu1 %v1297_v41 }
 0x455   : > { %1542 = vmatprep.mubr.bf16.mxu0 %v1300_v0  ;;  %2359 = vmatmul.mubr.bf16.vlgmr.msra.gmra.mrb[16].mxu1 %v1298_v35 }
 0x456   : > { %2363 = vmatpush3.bf16.msra.mxu0 %v2607_v43  ;;  %2383 = vmatpush3.bf16.msra.mxu1 %v2615_v6 }
 0x457   : > { %2364 = vmatprep.subr.bf16.mxu0 %v2608_v1  ;;  %2384 = vmatprep.subr.bf16.mxu1 %v2851_v34 }
 0x458   : > { %2398 = vmatprep.mubr.msk.bf16.mxu1 %vm2852_vm14, %v2851_v34 }
 0x45a   : > { %2365 = vmatpush3.bf16.msra.mxu0 %v2608_v1  ;;  %2385 = vmatpush3.bf16.msra.mxu1 %v2616_v7 }
 0x45b   : > { %2366 = vmatprep.subr.bf16.mxu0 %v2609_v9  ;;  %2386 = vmatprep.subr.bf16.mxu1 %v2851_v34 }
 0x45c   : > { %1543 = vmatmul.mubr.bf16.gmra.mrb[20].mxu0 %v1296_v17 }
 0x45e   : > { %2367 = vmatpush3.bf16.msra.mxu0 %v2609_v9  ;;  %2387 = vmatpush3.bf16.msra.mxu1 %v2617_v8 }
 0x45f   : > { %2368 = vmatprep.subr.bf16.mxu0 %v2610_v37  ;;  %2388 = vmatprep.subr.bf16.mxu1 %v2851_v34 }
 0x462   : > { %2369 = vmatpush3.bf16.msra.mxu0 %v2610_v37  ;;  %2389 = vmatpush3.bf16.msra.mxu1 %v2618_v10 }
 0x463   : > { %2370 = vmatprep.subr.bf16.mxu0 %v2611_v2  ;;  %2390 = vmatprep.subr.bf16.mxu1 %v2851_v34 }
 0x466   : > { %2371 = vmatpush3.bf16.msra.mxu0 %v2611_v2  ;;  %2391 = vmatpush3.bf16.msra.mxu1 %v2619_v12 }
 0x467   : > { %2372 = vmatprep.subr.bf16.mxu0 %v2612_v3  ;;  %2392 = vmatprep.subr.bf16.mxu1 %v2851_v34 }
 0x46a   : > { %2373 = vmatpush3.bf16.msra.mxu0 %v2612_v3  ;;  %2393 = vmatpush3.bf16.msra.mxu1 %v2620_v14 }
 0x46b   : > { %2374 = vmatprep.subr.bf16.mxu0 %v2613_v4  ;;  %2394 = vmatprep.subr.bf16.mxu1 %v2851_v34 }
 0x46e   : > { %2375 = vmatpush3.bf16.msra.mxu0 %v2613_v4  ;;  %2395 = vmatpush3.bf16.msra.mxu1 %v2621_v47 }
 0x46f   : > { %2376 = vmatprep.subr.bf16.mxu0 %v2614_v5  ;;  %2396 = vmatprep.subr.bf16.mxu1 %v2851_v34  ;;  %v2091_v34 = vld [vmem:[%s3370_s17] ss:$0 sm:$0xff] }
 0x472   : > { %2377 = vmatpush3.bf16.msra.mxu0 %v2614_v5  ;;  %2397 = vmatpush3.bf16.msra.mxu1 %v2622_v48 }
 0x527   : > { %v2221_v15 = vpop.f32.mrb[16].mxu0 }
 0x528   : > { %v2222_v16 = vpop.f32.mrb[17].mxu0  ;;  %v2360_v18 = vpop.f32.mrb[16].mxu1 }
 0x529   : > { %v2223_v36 = vadd.f32 %v2222_v16, %v2221_v15  ;;  %v2224_v19 = vpop.f32.mrb[18].mxu0  ;;  %v1584_v32 = vpop.f32.mrb[17].mxu1 }
 0x52a   : > { %v2225_v20 = vpop.f32.mrb[19].mxu0  ;;  %v2361_v21 = vpop.f32.mrb[18].mxu1 }
 0x52b   : > { %v1537_v22 = vadd.f32 %v2223_v36, %v2056_v31  ;;  %v2226_v23 = vadd.f32 %v2225_v20, %v2224_v19  ;;  %v1587_v30 = vpop.f32.mrb[19].mxu1 }
 0x52d   : > { %v1585_v33 = vadd.f32 %v1584_v32, %v1537_v22  ;;  %v1540_v24 = vadd.f32 %v2226_v23, %v2056_v31 }
 0x52f   : > { %v1588_v25 = vadd.f32 %v1587_v30, %v1540_v24  ;;  %v2227_v26 = vpop.f32.mrb[20].mxu0  ;;  %v1598_v28 = vmax.f32 %v1585_v33, 0.0 }
 0x530   : > { %v2228_v27 = vpop.f32.mrb[21].mxu0 }
 0x531   : > { %v1599_v29 = vmax.f32 %v1588_v25, 0.0  ;;  %v2229_v38 = vadd.f32 %v2228_v27, %v2227_v26  ;;  %v2230_v39 = vpop.f32.mrb[22].mxu0 }
 0x532   : > { %v2231_v40 = vpop.f32.mrb[23].mxu0 }
 0x533   : > { %v1601_v42 = vpack.c.bf16 %v1599_v29, %v1598_v28  ;;  %v1545_v43 = vadd.f32 %v2229_v38, %v2056_v31 }
 0x535   : > { %v1593_v44 = vadd.f32 %v2360_v18, %v1545_v43  ;;  %2378 = vmatprep.mubr.bf16.mxu0 %v1601_v42 }
 0x537   : > { %v1600_v45 = vmax.f32 %v1593_v44, 0.0 }
 0x539   : > { %v1602_v46 = vpack.c.bf16 %v1600_v45, %v1600_v45 }
 0x53b   : > { %2379 = vmatmul.mubr.bf16.vlgmr.msra.gmra.mrb[24].mxu0 %v1602_v46 }
 0x60e   : > { %v2380_v49 = vpop.f32.mrb[24].mxu0 }
 0x60f   : > { %v1710_v50 = vpop.f32.mrb[25].mxu0 }
 0x610   : > { %v2381_v52 = vpop.f32.mrb[26].mxu0 }
 0x611   : > { %v1712_v53 = vpop.f32.mrb[27].mxu0 }
 0x612   : > { %v1713_v54 = vadd.f32 %v2082_v51, %v1712_v53 }
 0x614   : > { %v1722_v55 = vadd.f32 %v1713_v54, %v3242_v56 }
 0x616   : > { %v1723_v57 = vpack.c.bf16 %v1722_v55, %v1722_v55 }
 0x618   : > { %2399 = vmatmul.mubr.bf16.vlgmr.msra.gmra.mrb[20].mxu1 %v1723_v57 }
 0x6eb   : > { %v1829_v58 = vpop.f32.mrb[20].mxu1 }
 0x6ec   : > { %v1830_v59 = vadd.f32 %v2091_v34, %v1829_v58  ;;  %v2400_v60 = vpop.f32.mrb[21].mxu1 }
 0x6ed   : > { %v1832_v56 = vpop.f32.mrb[22].mxu1 }
 0x6ee   : > { %1835 = vst [vmem:[%s358_s9] sm:$0xff] %v1830_v59  ;;  %v2401_v11 = vpop.f32.mrb[23].mxu1 }
 0x6ef   : > { %2750 = shalt.err (!%p2747_p1)
}
 0x6f0   : > { %s2751_s6 = scalar_lea.hbm %s3271_s4, 128  ;;  %s2755_s11 = scalar_lea.hbm %s3371_s20, 512 }
 0x6f1   : > { %p2752_p2 = scmp.ne.s32.totalorder %s3271_s4, %s2751_s6  ;;  %p2756_p13 = scmp.lt.u32.totalorder %s3271_s4, %s3371_s20 }
 0x6f2   : > { %p2757_p4 = scmp.lt.u32.totalorder %s2755_s11, %s2751_s6  ;;  %p2759_p6 = scmp.lt.u32.totalorder %s2751_s6, %s3271_s4 }
 0x6f3   : > { %p2753_p8 = pnand %p2752_p2, %p3069_p3 }
 0x6f4   : > { %p2758_p9 = por %p2757_p4, %p2756_p13 }
 0x6f5   : > { %p2754_p12 = pneg %p2753_p8 }
 0x6f6   : > { %p2760_p0 = por %p2759_p6, %p2758_p9 }
 0x6f8   : > { %p2761_p10 = pnand %p2760_p0, %p2754_p12 }
 0x6fa   : > { %2764 = shalt.err (!%p2761_p10)
}
 0x6fb   : > { %2420 = dma.vmem_to_hbm [thread:$0]  (%p3069_p3), %s3273_s22, 128, %s3271_s4, %s1837_s27  }
 0x6fc PF: > { %s3372_s7 = sld [smem:[#allocation15_spill]]  ;;  %s3373_s9 = sld [smem:[#allocation17_spill]] }
 0x6fd   : > { %p2447_p5 = scmp.ge.s32.totalorder %s2843_s8, 2 }
 0x702   : > { %s1864_s21 = sand.u32 1, %s3372_s7   ;;  %p3374_p7 = scmp.ne.s32.totalorder %s3373_s9, 0 }
 0x703   : > { %s1865_s14 = scalar_lea.sflag [#allocation4], %s1864_s21 }
 0x704   : > { %p2437_p11 = pnand %p2447_p5, %p3374_p7 }
 0x706   : > { %2810 = dma.done.wait (!%p2437_p11), %s1865_s14, 128  }
 0x707   : > { %2812 = vsyncadd (!%p2437_p11), %s1865_s14, 4294967168  ;;  %s25_s8 = sadd.s32 1, %s2843_s8   ;;  %s3375_s22 = smov %s3384_s24 }
 0x708   : > { %p22_p1 = scmp.ge.s32.totalorder %s25_s8, 6   ;;  %s3376_s24 = smov %s2819_s25 }
 0x709   : > { %s3377_s25 = smov %s2823_s26  ;;  %s3378_s26 = smov %s3086_s12 }
 0x70a   : > { %s3379_s27 = smov %s2835_s29  ;;  %s3380_s28 = smov %s2839_s30 }
 0x70b   : > { %s3381_s29 = smov %s3375_s22  ;;  %s3382_s30 = smov %s3388_s18 }
 0x70c   :  { %24 = sbr.rel (!%p22_p1) target bundleno = 15 (0xf), region = 113 }
 0x713   :  { %1870 = vsyncpa [#allocation3], 1 }
 0x714   :  { %1872 = vsyncpa [#allocation3 + $0x1], 1 }
 0x715   :  { %1873 = vsyncpa [#allocation6], 1 }
 0x716   :  { %1874 = vsyncpa [#allocation9], 1 }
 0x717   :  { %1875 = vsyncpa [#allocation4], 1 }
 0x718   :  { %1877 = vsyncpa [#allocation4 + $0x1], 1 }

</bundles_post_ra>
